<compile_context>
chip_gen: v5e
topology: v5e:2x2
jax: 0.10.0
libtpu: 0.0.40
codegen_flags: <defaults>
</compile_context>

<pallas_src>
import jax
import jax.numpy as jnp
from jax import lax
from jax.experimental import pallas as pl
from jax.experimental.pallas import tpu as pltpu

# Fixed model constants for flavour == 'hpm' (from the module's __init__).
MU = 0.01
BETA = 1.0
PHI = 0.12
CHI = 1.5
SIGMAF = 0.758

# Compile-time loop invariants (hoisted off the per-step critical path).
_MU_PHI = MU * PHI
_MU_CHI = MU * CHI
_MU_SF2 = (MU * SIGMAF) ** 2

# Polynomial-in-h constants (h = tanh(0.5*beta*a), nf = 0.5*(1+h)):
#   coef(p[t-1]) = 1 - mu*(nf*phi - nc*chi) = _C0 + _C1*h
#   coef(p[t-2]) = -mu*nc*chi              = -(_G0 - _G0*h)
_C0 = 1.0 - 0.5 * (_MU_PHI - _MU_CHI)
_C1 = -0.5 * (_MU_PHI + _MU_CHI)
_G0 = 0.5 * _MU_CHI

_LANES = 128
_SUBLANES = 8
_CHUNK = 16                      # time steps per inner chunk (two aligned 8-row groups)
_MAX_TILE_BYTES = 24 << 20       # 2 in-bufs + 2 out-bufs, keeps v7x (64 MiB VMEM) happy


def _hpm_kernel(pars_ref, es_ref, p_ref, a_ref, p1_ref, p2_ref, stage_ref):
    """One (time_block, batch_block) tile of the FW 'hpm' recurrence.

    pars_ref : SMEM (4,) f32 = [alpha0, alphan, alphap, sigmac] (scalar prefetch)
    es_ref   : VMEM (TB, BB) f32  noise e[t] driving the steps of this time tile
    p_ref    : VMEM (TB, BB) f32  output prices for this time tile
    a_ref, p1_ref, p2_ref : VMEM (1, BB) f32 carry across time tiles
                            (a carried in scaled form a_s = 0.5*beta*a)
    stage_ref: VMEM (16, BB) f32 staging buffer (one aligned store per 16 steps)
    """
    t_blk = pl.program_id(1)
    bb = a_ref.shape[1]

    alpha0 = pars_ref[0]
    alphan = pars_ref[1]
    alphap = pars_ref[2]
    sigmac = pars_ref[3]

    # Traced scalar invariants, pre-broadcast ONCE to (1, bb) vectors
    # (JAX does not CSE broadcast_in_dim; keep splats off the per-step path).
    sc2 = (MU * sigmac) * (MU * sigmac)
    v2 = 0.25 * (_MU_SF2 + sc2)              # variance Horner: (v2*h + v1)*h + v2
    v1 = 0.5 * (_MU_SF2 - sc2)
    ah = (0.5 * BETA) * alphan                # a-update in scaled form
    a0 = (0.5 * BETA) * alpha0
    ap = (0.5 * BETA) * alphap

    def bcast(x):
        return jnp.full((1, bb), x, jnp.float32)

    v2_v, v1_v = bcast(v2), bcast(v1)
    ah_v, a0_v, ap_v = bcast(ah), bcast(a0), bcast(ap)

    @pl.when(t_blk == 0)
    def _():
        # Per-path initial state: a = alpha0 (scaled), p[0] = p[-1] = 0.
        a_ref[...] = a0_v
        p1_ref[...] = jnp.zeros_like(p1_ref)
        p2_ref[...] = jnp.zeros_like(p2_ref)

    n_chunks = es_ref.shape[0] // _CHUNK

    def chunk(k, carry):
        a_s, p1, p2 = carry
        base = pl.multiple_of(k * _CHUNK, _CHUNK)
        e_chunk = es_ref[pl.ds(base, _CHUNK), :]          # one aligned vld / 16 steps
        for i in range(_CHUNK):                           # statically unrolled
            h = jnp.tanh(a_s)                             # single EUP op
            coef1 = _C0 + _C1 * h                         # compile-time constants
            g = _G0 - _G0 * h
            var = (v2_v * h + v1_v) * h + v2_v            # Horner, hoisted vectors
            p_t = coef1 * p1 - g * p2 \
                + jnp.sqrt(var) * e_chunk[i:i + 1, :]
            stage_ref[i:i + 1, :] = p_t                   # static-offset staging store
            a_s = ah_v * h + a0_v + ap_v * (p1 * p1)      # uses old p[t-1]
            p2 = p1
            p1 = p_t
        p_ref[pl.ds(base, _CHUNK), :] = stage_ref[...]    # one aligned vst / 16 steps
        return (a_s, p1, p2)

    carry0 = (a_ref[...], p1_ref[...], p2_ref[...])
    a_f, p1_f, p2_f = lax.fori_loop(0, n_chunks, chunk, carry0)
    a_ref[...] = a_f
    p1_ref[...] = p1_f
    p2_ref[...] = p2_f


def _round_up(x, m):
    return ((x + m - 1) // m) * m


def _cdiv(a, b):
    return -(-a // b)


def _pick_bb(batch, block_b):
    """Pick the batch (lane) tile: minimise padded work with a ~3-vreg latency
    floor per step, prefer >=2 blocks when the batch can feed two TensorCores."""
    b_lanes = _round_up(max(batch, 1), _LANES)
    cap = max(_LANES, min(_round_up(block_b, _LANES), b_lanes))
    best_key, best_bb = None, _LANES
    for bb in range(_LANES, cap + _LANES, _LANES):
        nblk = _cdiv(batch, bb)
        cost = nblk * max(bb, 3 * _LANES)     # blocks below ~3 vregs are latency-bound
        multi_penalty = int(batch >= 1024 and nblk < 2)   # megacore split when possible
        key = (multi_penalty, cost, -bb)
        if best_key is None or key < best_key:
            best_key, best_bb = key, bb
    return best_bb


def franke_westerhoff_hpm_batch(pars, es, *, block_t=2048, block_b=512):
    """Batched Franke-Westerhoff 'hpm' simulation.

    pars: (4,) f32 = [alpha0, alphan, alphap, sigmac] (shared across paths)
    es:   (T, B) f32 noise, one independent simulation path per column.
    Returns (T-1, B) f32: p[1], ..., p[T-1] per path (== PyTorch p[1:-1]).
    """
    pars = jnp.asarray(pars, jnp.float32)
    es = jnp.asarray(es, jnp.float32)
    T, B = es.shape
    N = T - 1                                 # number of recurrence steps / outputs
    if N <= 0:
        return jnp.zeros((0, B), jnp.float32)

    # Batch tile (lanes) and time tile (sublanes).  No wrapper-side padding:
    # ragged last blocks are handled by Pallas partial-tile DMA.
    bb = _pick_bb(B, block_b)
    tb = min(_round_up(max(block_t, _CHUNK), _CHUNK), _round_up(N, _CHUNK))
    while 16 * tb * bb > _MAX_TILE_BYTES and tb > _CHUNK:   # 4 f32 buffers, double-buffered
        tb = max(_CHUNK, _round_up(tb // 2, _CHUNK))

    grid = (_cdiv(B, bb), _cdiv(N, tb))   # (parallel over path blocks, sequential over time)

    vmem_need = 16 * tb * bb + (3 + _CHUNK) * bb * 4
    vmem_limit = int(min(56 << 20, max(32 << 20, vmem_need + (8 << 20))))

    out = pl.pallas_call(
        _hpm_kernel,
        out_shape=jax.ShapeDtypeStruct((N, B), jnp.float32),
        grid_spec=pltpu.PrefetchScalarGridSpec(
            num_scalar_prefetch=1,
            grid=grid,
            in_specs=[pl.BlockSpec((tb, bb), lambda b, t, _: (t, b))],
            out_specs=pl.BlockSpec((tb, bb), lambda b, t, _: (t, b)),
            scratch_shapes=[
                pltpu.VMEM((1, bb), jnp.float32),          # a (scaled)
                pltpu.VMEM((1, bb), jnp.float32),          # p[t-1]
                pltpu.VMEM((1, bb), jnp.float32),          # p[t-2]
                pltpu.VMEM((_CHUNK, bb), jnp.float32),     # 16-row staging buffer
            ],
        ),
        compiler_params=pltpu.CompilerParams(
            dimension_semantics=("parallel", "arbitrary"),
            vmem_limit_bytes=vmem_limit),
    )(pars, es)

    return out


def franke_westerhoff_hpm(pars, es):
    """Single-path forward matching the PyTorch module ('hpm'): returns p[1:-1]."""
    return franke_westerhoff_hpm_batch(pars, es[:, None])[:, 0]


def _hpm_reference(pars, es):
    """Pure-JAX reference of the same recurrence (batched over columns of es)."""
    alpha0, alphan, alphap, sigmac = [pars[i].astype(jnp.float32) for i in range(4)]
    T, B = es.shape

    def step(carry, e_prev):
        a, p1, p2 = carry
        nf = 1.0 / (1.0 + jnp.exp(-BETA * a))
        mean = (1.0 - MU * (nf * PHI - (1.0 - nf) * CHI)) * p1 \
               - MU * (1.0 - nf) * CHI * p2
        std = MU * jnp.sqrt((nf * SIGMAF) ** 2 + ((1.0 - nf) * sigmac) ** 2)
        p_t = mean + std * e_prev
        a_new = alphan * (2.0 * nf - 1.0) + alpha0 + alphap * p1 * p1
        return (a_new, p_t, p1), p_t

    init = (jnp.full((B,), alpha0, jnp.float32),
            jnp.zeros((B,), jnp.float32),
            jnp.zeros((B,), jnp.float32))
    _, p = lax.scan(step, init, es[:T - 1])      # p[1] .. p[T-1]
    return p                                      # (T-1, B)


if __name__ == "__main__":
    T = 50
    B = 256            # independent simulation paths, batched across lanes
    key = jax.random.PRNGKey(0)
    k_pars, k_es = jax.random.split(key)

    # pars = [alpha0, alphan, alphap, sigmac]
    pars = jax.random.uniform(k_pars, (4,), dtype=jnp.float32, minval=0.1, maxval=2.0)
    es = jax.random.normal(k_es, (T, B), dtype=jnp.float32)

    ref = jax.block_until_ready(_hpm_reference(pars, es))

    # Batched kernel vs. pure-JAX reference.
    out = jax.block_until_ready(franke_westerhoff_hpm_batch(pars, es))
    assert out.shape == (T - 1, B), out.shape
    assert jnp.allclose(out, ref, atol=1e-4, rtol=1e-4), \
        float(jnp.max(jnp.abs(out - ref)))

    # Ragged batch (partial lane block, no wrapper-side padding).
    Br = 200
    out_r = jax.block_until_ready(franke_westerhoff_hpm_batch(pars, es[:, :Br]))
    assert out_r.shape == (T - 1, Br), out_r.shape
    assert jnp.allclose(out_r, ref[:, :Br], atol=1e-4, rtol=1e-4), \
        float(jnp.max(jnp.abs(out_r - ref[:, :Br])))

    # Single-path API (matches the PyTorch forward for flavour == 'hpm').
    out1 = jax.block_until_ready(franke_westerhoff_hpm(pars, es[:, 0]))
    assert out1.shape == (T - 1,), out1.shape
    assert jnp.allclose(out1, ref[:, 0], atol=1e-4, rtol=1e-4)

    print("KERNEL_OK")
</pallas_src>

<mosaic_0001>
module attributes {stable_mosaic.version = 11 : i64} {
  func.func @_hpm_kernel(%arg0: i32, %arg1: i32, %arg2: memref<4xf32, #tpu.memory_space<smem>>, %arg3: memref<64x256xf32, #tpu.memory_space<vmem>>, %arg4: memref<64x256xf32, #tpu.memory_space<vmem>>, %arg5: memref<1x256xf32, #tpu.memory_space<vmem>>, %arg6: memref<1x256xf32, #tpu.memory_space<vmem>>, %arg7: memref<1x256xf32, #tpu.memory_space<vmem>>, %arg8: memref<16x256xf32, #tpu.memory_space<vmem>>) attributes {dimension_semantics = [#tpu.dimension_semantics<parallel>, #tpu.dimension_semantics<arbitrary>], iteration_bounds = array<i64: 1, 1>, scalar_prefetch = 1 : i64, scratch_operands = 4 : i64, tpu.core_type = #tpu.core_type<tc>, window_params = [{transform_indices = @transform_0, window_bounds = array<i64: 64, 256>}, {transform_indices = @transform_1, window_bounds = array<i64: 64, 256>}]} {
    %c0 = arith.constant 0 : index
    %0 = memref.load %arg2[%c0] : memref<4xf32, #tpu.memory_space<smem>>
    %c1 = arith.constant 1 : index
    %1 = memref.load %arg2[%c1] : memref<4xf32, #tpu.memory_space<smem>>
    %c2 = arith.constant 2 : index
    %2 = memref.load %arg2[%c2] : memref<4xf32, #tpu.memory_space<smem>>
    %c3 = arith.constant 3 : index
    %3 = memref.load %arg2[%c3] : memref<4xf32, #tpu.memory_space<smem>>
    %cst = arith.constant 0.00999999977 : f32
    %4 = arith.mulf %cst, %3 : f32
    %cst_0 = arith.constant 0.00999999977 : f32
    %5 = arith.mulf %cst_0, %3 : f32
    %6 = arith.mulf %4, %5 : f32
    %cst_1 = arith.constant 5.745640e-05 : f32
    %7 = arith.addf %cst_1, %6 : f32
    %cst_2 = arith.constant 2.500000e-01 : f32
    %8 = arith.mulf %cst_2, %7 : f32
    %cst_3 = arith.constant 5.745640e-05 : f32
    %9 = arith.subf %cst_3, %6 : f32
    %cst_4 = arith.constant 5.000000e-01 : f32
    %10 = arith.mulf %cst_4, %9 : f32
    %cst_5 = arith.constant 5.000000e-01 : f32
    %11 = arith.mulf %cst_5, %1 : f32
    %cst_6 = arith.constant 5.000000e-01 : f32
    %12 = arith.mulf %cst_6, %0 : f32
    %cst_7 = arith.constant 5.000000e-01 : f32
    %13 = arith.mulf %cst_7, %2 : f32
    %14 = vector.broadcast %8 : f32 to vector<1x256xf32>
    %15 = vector.broadcast %10 : f32 to vector<1x256xf32>
    %16 = vector.broadcast %11 : f32 to vector<1x256xf32>
    %17 = vector.broadcast %12 : f32 to vector<1x256xf32>
    %18 = vector.broadcast %13 : f32 to vector<1x256xf32>
    %c0_i32 = arith.constant 0 : i32
    %19 = arith.cmpi eq, %arg1, %c0_i32 : i32
    %20 = arith.extui %19 : i1 to i32
    %c0_i32_8 = arith.constant 0 : i32
    %21 = arith.cmpi ne, %20, %c0_i32_8 : i32
    scf.if %21 {
      %c0_23 = arith.constant 0 : index
      %c0_24 = arith.constant 0 : index
      %30 = vector.load %arg5[%c0_23, %c0_24] : memref<1x256xf32, #tpu.memory_space<vmem>>, vector<1x256xf32>
      tpu.vector_store %arg5[%c0_23, %c0_24], %17 {strides = array<i32>} : memref<1x256xf32, #tpu.memory_space<vmem>>, vector<1x256xf32>,
      %cst_25 = arith.constant 0.000000e+00 : f32
      %31 = vector.broadcast %cst_25 : f32 to vector<1x256xf32>
      %c0_26 = arith.constant 0 : index
      %c0_27 = arith.constant 0 : index
      %32 = vector.load %arg6[%c0_26, %c0_27] : memref<1x256xf32, #tpu.memory_space<vmem>>, vector<1x256xf32>
      tpu.vector_store %arg6[%c0_26, %c0_27], %31 {strides = array<i32>} : memref<1x256xf32, #tpu.memory_space<vmem>>, vector<1x256xf32>,
      %cst_28 = arith.constant 0.000000e+00 : f32
      %33 = vector.broadcast %cst_28 : f32 to vector<1x256xf32>
      %c0_29 = arith.constant 0 : index
      %c0_30 = arith.constant 0 : index
      %34 = vector.load %arg7[%c0_29, %c0_30] : memref<1x256xf32, #tpu.memory_space<vmem>>, vector<1x256xf32>
      tpu.vector_store %arg7[%c0_29, %c0_30], %33 {strides = array<i32>} : memref<1x256xf32, #tpu.memory_space<vmem>>, vector<1x256xf32>,
    } else {
    }
    %c0_9 = arith.constant 0 : index
    %c0_10 = arith.constant 0 : index
    %22 = vector.load %arg5[%c0_9, %c0_10] : memref<1x256xf32, #tpu.memory_space<vmem>>, vector<1x256xf32>
    %c0_11 = arith.constant 0 : index
    %c0_12 = arith.constant 0 : index
    %23 = vector.load %arg6[%c0_11, %c0_12] : memref<1x256xf32, #tpu.memory_space<vmem>>, vector<1x256xf32>
    %c0_13 = arith.constant 0 : index
    %c0_14 = arith.constant 0 : index
    %24 = vector.load %arg7[%c0_13, %c0_14] : memref<1x256xf32, #tpu.memory_space<vmem>>, vector<1x256xf32>
    %c0_i32_15 = arith.constant 0 : i32
    %c4_i32 = arith.constant 4 : i32
    %25 = arith.addi %c0_i32_15, %c4_i32 : i32
    %c1_i32 = arith.constant 1 : i32
    %26:3 = scf.for %arg9 = %c0_i32_15 to %25 step %c1_i32 iter_args(%arg10 = %22, %arg11 = %23, %arg12 = %24) -> (vector<1x256xf32>, vector<1x256xf32>, vector<1x256xf32>)  : i32 {
      %c16_i32 = arith.constant 16 : i32
      %30 = arith.muli %arg9, %c16_i32 : i32
      %31 = tpu.assume_multiple %30, 16 : i32
      %32 = arith.index_cast %31 : i32 to index
      %c0_23 = arith.constant 0 : index
      %33 = vector.load %arg3[%32, %c0_23] : memref<64x256xf32, #tpu.memory_space<vmem>>, vector<16x256xf32>
      %34 = math.tanh %arg10 : vector<1x256xf32>
      %cst_24 = arith.constant -8.100000e-03 : f32
      %35 = vector.broadcast %cst_24 : f32 to vector<1x256xf32>
      %36 = arith.mulf %35, %34 : vector<1x256xf32>
      %cst_25 = arith.constant 1.006900e+00 : f32
      %37 = vector.broadcast %cst_25 : f32 to vector<1x256xf32>
      %38 = arith.addf %37, %36 : vector<1x256xf32>
      %cst_26 = arith.constant 7.500000e-03 : f32
      %39 = vector.broadcast %cst_26 : f32 to vector<1x256xf32>
      %40 = arith.mulf %39, %34 : vector<1x256xf32>
      %cst_27 = arith.constant 7.500000e-03 : f32
      %41 = vector.broadcast %cst_27 : f32 to vector<1x256xf32>
      %42 = arith.subf %41, %40 : vector<1x256xf32>
      %43 = arith.mulf %14, %34 : vector<1x256xf32>
      %44 = arith.addf %43, %15 : vector<1x256xf32>
      %45 = arith.mulf %44, %34 : vector<1x256xf32>
      %46 = arith.addf %45, %14 : vector<1x256xf32>
      %47 = arith.mulf %38, %arg11 : vector<1x256xf32>
      %48 = arith.mulf %42, %arg12 : vector<1x256xf32>
      %49 = arith.subf %47, %48 : vector<1x256xf32>
      %50 = math.sqrt %46 : vector<1x256xf32>
      %51 = vector.extract_strided_slice %33 {offsets = [0, 0], sizes = [1, 256], strides = [1, 1]} : vector<16x256xf32> to vector<1x256xf32>
      %52 = arith.mulf %50, %51 : vector<1x256xf32>
      %53 = arith.addf %49, %52 : vector<1x256xf32>
      %c0_28 = arith.constant 0 : index
      %c0_29 = arith.constant 0 : index
      %54 = vector.load %arg8[%c0_28, %c0_29] : memref<16x256xf32, #tpu.memory_space<vmem>>, vector<1x256xf32>
      tpu.vector_store %arg8[%c0_28, %c0_29], %53 {strides = array<i32>} : memref<16x256xf32, #tpu.memory_space<vmem>>, vector<1x256xf32>,
      %55 = arith.mulf %16, %34 : vector<1x256xf32>
      %56 = arith.addf %55, %17 : vector<1x256xf32>
      %57 = arith.mulf %arg11, %arg11 : vector<1x256xf32>
      %58 = arith.mulf %18, %57 : vector<1x256xf32>
      %59 = arith.addf %56, %58 : vector<1x256xf32>
      %60 = math.tanh %59 : vector<1x256xf32>
      %cst_30 = arith.constant -8.100000e-03 : f32
      %61 = vector.broadcast %cst_30 : f32 to vector<1x256xf32>
      %62 = arith.mulf %61, %60 : vector<1x256xf32>
      %cst_31 = arith.constant 1.006900e+00 : f32
      %63 = vector.broadcast %cst_31 : f32 to vector<1x256xf32>
      %64 = arith.addf %63, %62 : vector<1x256xf32>
      %cst_32 = arith.constant 7.500000e-03 : f32
      %65 = vector.broadcast %cst_32 : f32 to vector<1x256xf32>
      %66 = arith.mulf %65, %60 : vector<1x256xf32>
      %cst_33 = arith.constant 7.500000e-03 : f32
      %67 = vector.broadcast %cst_33 : f32 to vector<1x256xf32>
      %68 = arith.subf %67, %66 : vector<1x256xf32>
      %69 = arith.mulf %14, %60 : vector<1x256xf32>
      %70 = arith.addf %69, %15 : vector<1x256xf32>
      %71 = arith.mulf %70, %60 : vector<1x256xf32>
      %72 = arith.addf %71, %14 : vector<1x256xf32>
      %73 = arith.mulf %64, %53 : vector<1x256xf32>
      %74 = arith.mulf %68, %arg11 : vector<1x256xf32>
      %75 = arith.subf %73, %74 : vector<1x256xf32>
      %76 = math.sqrt %72 : vector<1x256xf32>
      %77 = vector.extract_strided_slice %33 {offsets = [1, 0], sizes = [1, 256], strides = [1, 1]} : vector<16x256xf32> to vector<1x256xf32>
      %78 = arith.mulf %76, %77 : vector<1x256xf32>
      %79 = arith.addf %75, %78 : vector<1x256xf32>
      %c1_34 = arith.constant 1 : index
      %c0_35 = arith.constant 0 : index
      %80 = vector.load %arg8[%c1_34, %c0_35] : memref<16x256xf32, #tpu.memory_space<vmem>>, vector<1x256xf32>
      tpu.vector_store %arg8[%c1_34, %c0_35], %79 {strides = array<i32>} : memref<16x256xf32, #tpu.memory_space<vmem>>, vector<1x256xf32>,
      %81 = arith.mulf %16, %60 : vector<1x256xf32>
      %82 = arith.addf %81, %17 : vector<1x256xf32>
      %83 = arith.mulf %53, %53 : vector<1x256xf32>
      %84 = arith.mulf %18, %83 : vector<1x256xf32>
      %85 = arith.addf %82, %84 : vector<1x256xf32>
      %86 = math.tanh %85 : vector<1x256xf32>
      %cst_36 = arith.constant -8.100000e-03 : f32
      %87 = vector.broadcast %cst_36 : f32 to vector<1x256xf32>
      %88 = arith.mulf %87, %86 : vector<1x256xf32>
      %cst_37 = arith.constant 1.006900e+00 : f32
      %89 = vector.broadcast %cst_37 : f32 to vector<1x256xf32>
      %90 = arith.addf %89, %88 : vector<1x256xf32>
      %cst_38 = arith.constant 7.500000e-03 : f32
      %91 = vector.broadcast %cst_38 : f32 to vector<1x256xf32>
      %92 = arith.mulf %91, %86 : vector<1x256xf32>
      %cst_39 = arith.constant 7.500000e-03 : f32
      %93 = vector.broadcast %cst_39 : f32 to vector<1x256xf32>
      %94 = arith.subf %93, %92 : vector<1x256xf32>
      %95 = arith.mulf %14, %86 : vector<1x256xf32>
      %96 = arith.addf %95, %15 : vector<1x256xf32>
      %97 = arith.mulf %96, %86 : vector<1x256xf32>
      %98 = arith.addf %97, %14 : vector<1x256xf32>
      %99 = arith.mulf %90, %79 : vector<1x256xf32>
      %100 = arith.mulf %94, %53 : vector<1x256xf32>
      %101 = arith.subf %99, %100 : vector<1x256xf32>
      %102 = math.sqrt %98 : vector<1x256xf32>
      %103 = vector.extract_strided_slice %33 {offsets = [2, 0], sizes = [1, 256], strides = [1, 1]} : vector<16x256xf32> to vector<1x256xf32>
      %104 = arith.mulf %102, %103 : vector<1x256xf32>
      %105 = arith.addf %101, %104 : vector<1x256xf32>
      %c2_40 = arith.constant 2 : index
      %c0_41 = arith.constant 0 : index
      %106 = vector.load %arg8[%c2_40, %c0_41] : memref<16x256xf32, #tpu.memory_space<vmem>>, vector<1x256xf32>
      tpu.vector_store %arg8[%c2_40, %c0_41], %105 {strides = array<i32>} : memref<16x256xf32, #tpu.memory_space<vmem>>, vector<1x256xf32>,
      %107 = arith.mulf %16, %86 : vector<1x256xf32>
      %108 = arith.addf %107, %17 : vector<1x256xf32>
      %109 = arith.mulf %79, %79 : vector<1x256xf32>
      %110 = arith.mulf %18, %109 : vector<1x256xf32>
      %111 = arith.addf %108, %110 : vector<1x256xf32>
      %112 = math.tanh %111 : vector<1x256xf32>
      %cst_42 = arith.constant -8.100000e-03 : f32
      %113 = vector.broadcast %cst_42 : f32 to vector<1x256xf32>
      %114 = arith.mulf %113, %112 : vector<1x256xf32>
      %cst_43 = arith.constant 1.006900e+00 : f32
      %115 = vector.broadcast %cst_43 : f32 to vector<1x256xf32>
      %116 = arith.addf %115, %114 : vector<1x256xf32>
      %cst_44 = arith.constant 7.500000e-03 : f32
      %117 = vector.broadcast %cst_44 : f32 to vector<1x256xf32>
      %118 = arith.mulf %117, %112 : vector<1x256xf32>
      %cst_45 = arith.constant 7.500000e-03 : f32
      %119 = vector.broadcast %cst_45 : f32 to vector<1x256xf32>
      %120 = arith.subf %119, %118 : vector<1x256xf32>
      %121 = arith.mulf %14, %112 : vector<1x256xf32>
      %122 = arith.addf %121, %15 : vector<1x256xf32>
      %123 = arith.mulf %122, %112 : vector<1x256xf32>
      %124 = arith.addf %123, %14 : vector<1x256xf32>
      %125 = arith.mulf %116, %105 : vector<1x256xf32>
      %126 = arith.mulf %120, %79 : vector<1x256xf32>
      %127 = arith.subf %125, %126 : vector<1x256xf32>
      %128 = math.sqrt %124 : vector<1x256xf32>
      %129 = vector.extract_strided_slice %33 {offsets = [3, 0], sizes = [1, 256], strides = [1, 1]} : vector<16x256xf32> to vector<1x256xf32>
      %130 = arith.mulf %128, %129 : vector<1x256xf32>
      %131 = arith.addf %127, %130 : vector<1x256xf32>
      %c3_46 = arith.constant 3 : index
      %c0_47 = arith.constant 0 : index
      %132 = vector.load %arg8[%c3_46, %c0_47] : memref<16x256xf32, #tpu.memory_space<vmem>>, vector<1x256xf32>
      tpu.vector_store %arg8[%c3_46, %c0_47], %131 {strides = array<i32>} : memref<16x256xf32, #tpu.memory_space<vmem>>, vector<1x256xf32>,
      %133 = arith.mulf %16, %112 : vector<1x256xf32>
      %134 = arith.addf %133, %17 : vector<1x256xf32>
      %135 = arith.mulf %105, %105 : vector<1x256xf32>
      %136 = arith.mulf %18, %135 : vector<1x256xf32>
      %137 = arith.addf %134, %136 : vector<1x256xf32>
      %138 = math.tanh %137 : vector<1x256xf32>
      %cst_48 = arith.constant -8.100000e-03 : f32
      %139 = vector.broadcast %cst_48 : f32 to vector<1x256xf32>
      %140 = arith.mulf %139, %138 : vector<1x256xf32>
      %cst_49 = arith.constant 1.006900e+00 : f32
      %141 = vector.broadcast %cst_49 : f32 to vector<1x256xf32>
      %142 = arith.addf %141, %140 : vector<1x256xf32>
      %cst_50 = arith.constant 7.500000e-03 : f32
      %143 = vector.broadcast %cst_50 : f32 to vector<1x256xf32>
      %144 = arith.mulf %143, %138 : vector<1x256xf32>
      %cst_51 = arith.constant 7.500000e-03 : f32
      %145 = vector.broadcast %cst_51 : f32 to vector<1x256xf32>
      %146 = arith.subf %145, %144 : vector<1x256xf32>
      %147 = arith.mulf %14, %138 : vector<1x256xf32>
      %148 = arith.addf %147, %15 : vector<1x256xf32>
      %149 = arith.mulf %148, %138 : vector<1x256xf32>
      %150 = arith.addf %149, %14 : vector<1x256xf32>
      %151 = arith.mulf %142, %131 : vector<1x256xf32>
      %152 = arith.mulf %146, %105 : vector<1x256xf32>
      %153 = arith.subf %151, %152 : vector<1x256xf32>
      %154 = math.sqrt %150 : vector<1x256xf32>
      %155 = vector.extract_strided_slice %33 {offsets = [4, 0], sizes = [1, 256], strides = [1, 1]} : vector<16x256xf32> to vector<1x256xf32>
      %156 = arith.mulf %154, %155 : vector<1x256xf32>
      %157 = arith.addf %153, %156 : vector<1x256xf32>
      %c4 = arith.constant 4 : index
      %c0_52 = arith.constant 0 : index
      %158 = vector.load %arg8[%c4, %c0_52] : memref<16x256xf32, #tpu.memory_space<vmem>>, vector<1x256xf32>
      tpu.vector_store %arg8[%c4, %c0_52], %157 {strides = array<i32>} : memref<16x256xf32, #tpu.memory_space<vmem>>, vector<1x256xf32>,
      %159 = arith.mulf %16, %138 : vector<1x256xf32>
      %160 = arith.addf %159, %17 : vector<1x256xf32>
      %161 = arith.mulf %131, %131 : vector<1x256xf32>
      %162 = arith.mulf %18, %161 : vector<1x256xf32>
      %163 = arith.addf %160, %162 : vector<1x256xf32>
      %164 = math.tanh %163 : vector<1x256xf32>
      %cst_53 = arith.constant -8.100000e-03 : f32
      %165 = vector.broadcast %cst_53 : f32 to vector<1x256xf32>
      %166 = arith.mulf %165, %164 : vector<1x256xf32>
      %cst_54 = arith.constant 1.006900e+00 : f32
      %167 = vector.broadcast %cst_54 : f32 to vector<1x256xf32>
      %168 = arith.addf %167, %166 : vector<1x256xf32>
      %cst_55 = arith.constant 7.500000e-03 : f32
      %169 = vector.broadcast %cst_55 : f32 to vector<1x256xf32>
      %170 = arith.mulf %169, %164 : vector<1x256xf32>
      %cst_56 = arith.constant 7.500000e-03 : f32
      %171 = vector.broadcast %cst_56 : f32 to vector<1x256xf32>
      %172 = arith.subf %171, %170 : vector<1x256xf32>
      %173 = arith.mulf %14, %164 : vector<1x256xf32>
      %174 = arith.addf %173, %15 : vector<1x256xf32>
      %175 = arith.mulf %174, %164 : vector<1x256xf32>
      %176 = arith.addf %175, %14 : vector<1x256xf32>
      %177 = arith.mulf %168, %157 : vector<1x256xf32>
      %178 = arith.mulf %172, %131 : vector<1x256xf32>
      %179 = arith.subf %177, %178 : vector<1x256xf32>
      %180 = math.sqrt %176 : vector<1x256xf32>
      %181 = vector.extract_strided_slice %33 {offsets = [5, 0], sizes = [1, 256], strides = [1, 1]} : vector<16x256xf32> to vector<1x256xf32>
      %182 = arith.mulf %180, %181 : vector<1x256xf32>
      %183 = arith.addf %179, %182 : vector<1x256xf32>
      %c5 = arith.constant 5 : index
      %c0_57 = arith.constant 0 : index
      %184 = vector.load %arg8[%c5, %c0_57] : memref<16x256xf32, #tpu.memory_space<vmem>>, vector<1x256xf32>
      tpu.vector_store %arg8[%c5, %c0_57], %183 {strides = array<i32>} : memref<16x256xf32, #tpu.memory_space<vmem>>, vector<1x256xf32>,
      %185 = arith.mulf %16, %164 : vector<1x256xf32>
      %186 = arith.addf %185, %17 : vector<1x256xf32>
      %187 = arith.mulf %157, %157 : vector<1x256xf32>
      %188 = arith.mulf %18, %187 : vector<1x256xf32>
      %189 = arith.addf %186, %188 : vector<1x256xf32>
      %190 = math.tanh %189 : vector<1x256xf32>
      %cst_58 = arith.constant -8.100000e-03 : f32
      %191 = vector.broadcast %cst_58 : f32 to vector<1x256xf32>
      %192 = arith.mulf %191, %190 : vector<1x256xf32>
      %cst_59 = arith.constant 1.006900e+00 : f32
      %193 = vector.broadcast %cst_59 : f32 to vector<1x256xf32>
      %194 = arith.addf %193, %192 : vector<1x256xf32>
      %cst_60 = arith.constant 7.500000e-03 : f32
      %195 = vector.broadcast %cst_60 : f32 to vector<1x256xf32>
      %196 = arith.mulf %195, %190 : vector<1x256xf32>
      %cst_61 = arith.constant 7.500000e-03 : f32
      %197 = vector.broadcast %cst_61 : f32 to vector<1x256xf32>
      %198 = arith.subf %197, %196 : vector<1x256xf32>
      %199 = arith.mulf %14, %190 : vector<1x256xf32>
      %200 = arith.addf %199, %15 : vector<1x256xf32>
      %201 = arith.mulf %200, %190 : vector<1x256xf32>
      %202 = arith.addf %201, %14 : vector<1x256xf32>
      %203 = arith.mulf %194, %183 : vector<1x256xf32>
      %204 = arith.mulf %198, %157 : vector<1x256xf32>
      %205 = arith.subf %203, %204 : vector<1x256xf32>
      %206 = math.sqrt %202 : vector<1x256xf32>
      %207 = vector.extract_strided_slice %33 {offsets = [6, 0], sizes = [1, 256], strides = [1, 1]} : vector<16x256xf32> to vector<1x256xf32>
      %208 = arith.mulf %206, %207 : vector<1x256xf32>
      %209 = arith.addf %205, %208 : vector<1x256xf32>
      %c6 = arith.constant 6 : index
      %c0_62 = arith.constant 0 : index
      %210 = vector.load %arg8[%c6, %c0_62] : memref<16x256xf32, #tpu.memory_space<vmem>>, vector<1x256xf32>
      tpu.vector_store %arg8[%c6, %c0_62], %209 {strides = array<i32>} : memref<16x256xf32, #tpu.memory_space<vmem>>, vector<1x256xf32>,
      %211 = arith.mulf %16, %190 : vector<1x256xf32>
      %212 = arith.addf %211, %17 : vector<1x256xf32>
      %213 = arith.mulf %183, %183 : vector<1x256xf32>
      %214 = arith.mulf %18, %213 : vector<1x256xf32>
      %215 = arith.addf %212, %214 : vector<1x256xf32>
      %216 = math.tanh %215 : vector<1x256xf32>
      %cst_63 = arith.constant -8.100000e-03 : f32
      %217 = vector.broadcast %cst_63 : f32 to vector<1x256xf32>
      %218 = arith.mulf %217, %216 : vector<1x256xf32>
      %cst_64 = arith.constant 1.006900e+00 : f32
      %219 = vector.broadcast %cst_64 : f32 to vector<1x256xf32>
      %220 = arith.addf %219, %218 : vector<1x256xf32>
      %cst_65 = arith.constant 7.500000e-03 : f32
      %221 = vector.broadcast %cst_65 : f32 to vector<1x256xf32>
      %222 = arith.mulf %221, %216 : vector<1x256xf32>
      %cst_66 = arith.constant 7.500000e-03 : f32
      %223 = vector.broadcast %cst_66 : f32 to vector<1x256xf32>
      %224 = arith.subf %223, %222 : vector<1x256xf32>
      %225 = arith.mulf %14, %216 : vector<1x256xf32>
      %226 = arith.addf %225, %15 : vector<1x256xf32>
      %227 = arith.mulf %226, %216 : vector<1x256xf32>
      %228 = arith.addf %227, %14 : vector<1x256xf32>
      %229 = arith.mulf %220, %209 : vector<1x256xf32>
      %230 = arith.mulf %224, %183 : vector<1x256xf32>
      %231 = arith.subf %229, %230 : vector<1x256xf32>
      %232 = math.sqrt %228 : vector<1x256xf32>
      %233 = vector.extract_strided_slice %33 {offsets = [7, 0], sizes = [1, 256], strides = [1, 1]} : vector<16x256xf32> to vector<1x256xf32>
      %234 = arith.mulf %232, %233 : vector<1x256xf32>
      %235 = arith.addf %231, %234 : vector<1x256xf32>
      %c7 = arith.constant 7 : index
      %c0_67 = arith.constant 0 : index
      %236 = vector.load %arg8[%c7, %c0_67] : memref<16x256xf32, #tpu.memory_space<vmem>>, vector<1x256xf32>
      tpu.vector_store %arg8[%c7, %c0_67], %235 {strides = array<i32>} : memref<16x256xf32, #tpu.memory_space<vmem>>, vector<1x256xf32>,
      %237 = arith.mulf %16, %216 : vector<1x256xf32>
      %238 = arith.addf %237, %17 : vector<1x256xf32>
      %239 = arith.mulf %209, %209 : vector<1x256xf32>
      %240 = arith.mulf %18, %239 : vector<1x256xf32>
      %241 = arith.addf %238, %240 : vector<1x256xf32>
      %242 = math.tanh %241 : vector<1x256xf32>
      %cst_68 = arith.constant -8.100000e-03 : f32
      %243 = vector.broadcast %cst_68 : f32 to vector<1x256xf32>
      %244 = arith.mulf %243, %242 : vector<1x256xf32>
      %cst_69 = arith.constant 1.006900e+00 : f32
      %245 = vector.broadcast %cst_69 : f32 to vector<1x256xf32>
      %246 = arith.addf %245, %244 : vector<1x256xf32>
      %cst_70 = arith.constant 7.500000e-03 : f32
      %247 = vector.broadcast %cst_70 : f32 to vector<1x256xf32>
      %248 = arith.mulf %247, %242 : vector<1x256xf32>
      %cst_71 = arith.constant 7.500000e-03 : f32
      %249 = vector.broadcast %cst_71 : f32 to vector<1x256xf32>
      %250 = arith.subf %249, %248 : vector<1x256xf32>
      %251 = arith.mulf %14, %242 : vector<1x256xf32>
      %252 = arith.addf %251, %15 : vector<1x256xf32>
      %253 = arith.mulf %252, %242 : vector<1x256xf32>
      %254 = arith.addf %253, %14 : vector<1x256xf32>
      %255 = arith.mulf %246, %235 : vector<1x256xf32>
      %256 = arith.mulf %250, %209 : vector<1x256xf32>
      %257 = arith.subf %255, %256 : vector<1x256xf32>
      %258 = math.sqrt %254 : vector<1x256xf32>
      %259 = vector.extract_strided_slice %33 {offsets = [8, 0], sizes = [1, 256], strides = [1, 1]} : vector<16x256xf32> to vector<1x256xf32>
      %260 = arith.mulf %258, %259 : vector<1x256xf32>
      %261 = arith.addf %257, %260 : vector<1x256xf32>
      %c8 = arith.constant 8 : index
      %c0_72 = arith.constant 0 : index
      %262 = vector.load %arg8[%c8, %c0_72] : memref<16x256xf32, #tpu.memory_space<vmem>>, vector<1x256xf32>
      tpu.vector_store %arg8[%c8, %c0_72], %261 {strides = array<i32>} : memref<16x256xf32, #tpu.memory_space<vmem>>, vector<1x256xf32>,
      %263 = arith.mulf %16, %242 : vector<1x256xf32>
      %264 = arith.addf %263, %17 : vector<1x256xf32>
      %265 = arith.mulf %235, %235 : vector<1x256xf32>
      %266 = arith.mulf %18, %265 : vector<1x256xf32>
      %267 = arith.addf %264, %266 : vector<1x256xf32>
      %268 = math.tanh %267 : vector<1x256xf32>
      %cst_73 = arith.constant -8.100000e-03 : f32
      %269 = vector.broadcast %cst_73 : f32 to vector<1x256xf32>
      %270 = arith.mulf %269, %268 : vector<1x256xf32>
      %cst_74 = arith.constant 1.006900e+00 : f32
      %271 = vector.broadcast %cst_74 : f32 to vector<1x256xf32>
      %272 = arith.addf %271, %270 : vector<1x256xf32>
      %cst_75 = arith.constant 7.500000e-03 : f32
      %273 = vector.broadcast %cst_75 : f32 to vector<1x256xf32>
      %274 = arith.mulf %273, %268 : vector<1x256xf32>
      %cst_76 = arith.constant 7.500000e-03 : f32
      %275 = vector.broadcast %cst_76 : f32 to vector<1x256xf32>
      %276 = arith.subf %275, %274 : vector<1x256xf32>
      %277 = arith.mulf %14, %268 : vector<1x256xf32>
      %278 = arith.addf %277, %15 : vector<1x256xf32>
      %279 = arith.mulf %278, %268 : vector<1x256xf32>
      %280 = arith.addf %279, %14 : vector<1x256xf32>
      %281 = arith.mulf %272, %261 : vector<1x256xf32>
      %282 = arith.mulf %276, %235 : vector<1x256xf32>
      %283 = arith.subf %281, %282 : vector<1x256xf32>
      %284 = math.sqrt %280 : vector<1x256xf32>
      %285 = vector.extract_strided_slice %33 {offsets = [9, 0], sizes = [1, 256], strides = [1, 1]} : vector<16x256xf32> to vector<1x256xf32>
      %286 = arith.mulf %284, %285 : vector<1x256xf32>
      %287 = arith.addf %283, %286 : vector<1x256xf32>
      %c9 = arith.constant 9 : index
      %c0_77 = arith.constant 0 : index
      %288 = vector.load %arg8[%c9, %c0_77] : memref<16x256xf32, #tpu.memory_space<vmem>>, vector<1x256xf32>
      tpu.vector_store %arg8[%c9, %c0_77], %287 {strides = array<i32>} : memref<16x256xf32, #tpu.memory_space<vmem>>, vector<1x256xf32>,
      %289 = arith.mulf %16, %268 : vector<1x256xf32>
      %290 = arith.addf %289, %17 : vector<1x256xf32>
      %291 = arith.mulf %261, %261 : vector<1x256xf32>
      %292 = arith.mulf %18, %291 : vector<1x256xf32>
      %293 = arith.addf %290, %292 : vector<1x256xf32>
      %294 = math.tanh %293 : vector<1x256xf32>
      %cst_78 = arith.constant -8.100000e-03 : f32
      %295 = vector.broadcast %cst_78 : f32 to vector<1x256xf32>
      %296 = arith.mulf %295, %294 : vector<1x256xf32>
      %cst_79 = arith.constant 1.006900e+00 : f32
      %297 = vector.broadcast %cst_79 : f32 to vector<1x256xf32>
      %298 = arith.addf %297, %296 : vector<1x256xf32>
      %cst_80 = arith.constant 7.500000e-03 : f32
      %299 = vector.broadcast %cst_80 : f32 to vector<1x256xf32>
      %300 = arith.mulf %299, %294 : vector<1x256xf32>
      %cst_81 = arith.constant 7.500000e-03 : f32
      %301 = vector.broadcast %cst_81 : f32 to vector<1x256xf32>
      %302 = arith.subf %301, %300 : vector<1x256xf32>
      %303 = arith.mulf %14, %294 : vector<1x256xf32>
      %304 = arith.addf %303, %15 : vector<1x256xf32>
      %305 = arith.mulf %304, %294 : vector<1x256xf32>
      %306 = arith.addf %305, %14 : vector<1x256xf32>
      %307 = arith.mulf %298, %287 : vector<1x256xf32>
      %308 = arith.mulf %302, %261 : vector<1x256xf32>
      %309 = arith.subf %307, %308 : vector<1x256xf32>
      %310 = math.sqrt %306 : vector<1x256xf32>
      %311 = vector.extract_strided_slice %33 {offsets = [10, 0], sizes = [1, 256], strides = [1, 1]} : vector<16x256xf32> to vector<1x256xf32>
      %312 = arith.mulf %310, %311 : vector<1x256xf32>
      %313 = arith.addf %309, %312 : vector<1x256xf32>
      %c10 = arith.constant 10 : index
      %c0_82 = arith.constant 0 : index
      %314 = vector.load %arg8[%c10, %c0_82] : memref<16x256xf32, #tpu.memory_space<vmem>>, vector<1x256xf32>
      tpu.vector_store %arg8[%c10, %c0_82], %313 {strides = array<i32>} : memref<16x256xf32, #tpu.memory_space<vmem>>, vector<1x256xf32>,
      %315 = arith.mulf %16, %294 : vector<1x256xf32>
      %316 = arith.addf %315, %17 : vector<1x256xf32>
      %317 = arith.mulf %287, %287 : vector<1x256xf32>
      %318 = arith.mulf %18, %317 : vector<1x256xf32>
      %319 = arith.addf %316, %318 : vector<1x256xf32>
      %320 = math.tanh %319 : vector<1x256xf32>
      %cst_83 = arith.constant -8.100000e-03 : f32
      %321 = vector.broadcast %cst_83 : f32 to vector<1x256xf32>
      %322 = arith.mulf %321, %320 : vector<1x256xf32>
      %cst_84 = arith.constant 1.006900e+00 : f32
      %323 = vector.broadcast %cst_84 : f32 to vector<1x256xf32>
      %324 = arith.addf %323, %322 : vector<1x256xf32>
      %cst_85 = arith.constant 7.500000e-03 : f32
      %325 = vector.broadcast %cst_85 : f32 to vector<1x256xf32>
      %326 = arith.mulf %325, %320 : vector<1x256xf32>
      %cst_86 = arith.constant 7.500000e-03 : f32
      %327 = vector.broadcast %cst_86 : f32 to vector<1x256xf32>
      %328 = arith.subf %327, %326 : vector<1x256xf32>
      %329 = arith.mulf %14, %320 : vector<1x256xf32>
      %330 = arith.addf %329, %15 : vector<1x256xf32>
      %331 = arith.mulf %330, %320 : vector<1x256xf32>
      %332 = arith.addf %331, %14 : vector<1x256xf32>
      %333 = arith.mulf %324, %313 : vector<1x256xf32>
      %334 = arith.mulf %328, %287 : vector<1x256xf32>
      %335 = arith.subf %333, %334 : vector<1x256xf32>
      %336 = math.sqrt %332 : vector<1x256xf32>
      %337 = vector.extract_strided_slice %33 {offsets = [11, 0], sizes = [1, 256], strides = [1, 1]} : vector<16x256xf32> to vector<1x256xf32>
      %338 = arith.mulf %336, %337 : vector<1x256xf32>
      %339 = arith.addf %335, %338 : vector<1x256xf32>
      %c11 = arith.constant 11 : index
      %c0_87 = arith.constant 0 : index
      %340 = vector.load %arg8[%c11, %c0_87] : memref<16x256xf32, #tpu.memory_space<vmem>>, vector<1x256xf32>
      tpu.vector_store %arg8[%c11, %c0_87], %339 {strides = array<i32>} : memref<16x256xf32, #tpu.memory_space<vmem>>, vector<1x256xf32>,
      %341 = arith.mulf %16, %320 : vector<1x256xf32>
      %342 = arith.addf %341, %17 : vector<1x256xf32>
      %343 = arith.mulf %313, %313 : vector<1x256xf32>
      %344 = arith.mulf %18, %343 : vector<1x256xf32>
      %345 = arith.addf %342, %344 : vector<1x256xf32>
      %346 = math.tanh %345 : vector<1x256xf32>
      %cst_88 = arith.constant -8.100000e-03 : f32
      %347 = vector.broadcast %cst_88 : f32 to vector<1x256xf32>
      %348 = arith.mulf %347, %346 : vector<1x256xf32>
      %cst_89 = arith.constant 1.006900e+00 : f32
      %349 = vector.broadcast %cst_89 : f32 to vector<1x256xf32>
      %350 = arith.addf %349, %348 : vector<1x256xf32>
      %cst_90 = arith.constant 7.500000e-03 : f32
      %351 = vector.broadcast %cst_90 : f32 to vector<1x256xf32>
      %352 = arith.mulf %351, %346 : vector<1x256xf32>
      %cst_91 = arith.constant 7.500000e-03 : f32
      %353 = vector.broadcast %cst_91 : f32 to vector<1x256xf32>
      %354 = arith.subf %353, %352 : vector<1x256xf32>
      %355 = arith.mulf %14, %346 : vector<1x256xf32>
      %356 = arith.addf %355, %15 : vector<1x256xf32>
      %357 = arith.mulf %356, %346 : vector<1x256xf32>
      %358 = arith.addf %357, %14 : vector<1x256xf32>
      %359 = arith.mulf %350, %339 : vector<1x256xf32>
      %360 = arith.mulf %354, %313 : vector<1x256xf32>
      %361 = arith.subf %359, %360 : vector<1x256xf32>
      %362 = math.sqrt %358 : vector<1x256xf32>
      %363 = vector.extract_strided_slice %33 {offsets = [12, 0], sizes = [1, 256], strides = [1, 1]} : vector<16x256xf32> to vector<1x256xf32>
      %364 = arith.mulf %362, %363 : vector<1x256xf32>
      %365 = arith.addf %361, %364 : vector<1x256xf32>
      %c12 = arith.constant 12 : index
      %c0_92 = arith.constant 0 : index
      %366 = vector.load %arg8[%c12, %c0_92] : memref<16x256xf32, #tpu.memory_space<vmem>>, vector<1x256xf32>
      tpu.vector_store %arg8[%c12, %c0_92], %365 {strides = array<i32>} : memref<16x256xf32, #tpu.memory_space<vmem>>, vector<1x256xf32>,
      %367 = arith.mulf %16, %346 : vector<1x256xf32>
      %368 = arith.addf %367, %17 : vector<1x256xf32>
      %369 = arith.mulf %339, %339 : vector<1x256xf32>
      %370 = arith.mulf %18, %369 : vector<1x256xf32>
      %371 = arith.addf %368, %370 : vector<1x256xf32>
      %372 = math.tanh %371 : vector<1x256xf32>
      %cst_93 = arith.constant -8.100000e-03 : f32
      %373 = vector.broadcast %cst_93 : f32 to vector<1x256xf32>
      %374 = arith.mulf %373, %372 : vector<1x256xf32>
      %cst_94 = arith.constant 1.006900e+00 : f32
      %375 = vector.broadcast %cst_94 : f32 to vector<1x256xf32>
      %376 = arith.addf %375, %374 : vector<1x256xf32>
      %cst_95 = arith.constant 7.500000e-03 : f32
      %377 = vector.broadcast %cst_95 : f32 to vector<1x256xf32>
      %378 = arith.mulf %377, %372 : vector<1x256xf32>
      %cst_96 = arith.constant 7.500000e-03 : f32
      %379 = vector.broadcast %cst_96 : f32 to vector<1x256xf32>
      %380 = arith.subf %379, %378 : vector<1x256xf32>
      %381 = arith.mulf %14, %372 : vector<1x256xf32>
      %382 = arith.addf %381, %15 : vector<1x256xf32>
      %383 = arith.mulf %382, %372 : vector<1x256xf32>
      %384 = arith.addf %383, %14 : vector<1x256xf32>
      %385 = arith.mulf %376, %365 : vector<1x256xf32>
      %386 = arith.mulf %380, %339 : vector<1x256xf32>
      %387 = arith.subf %385, %386 : vector<1x256xf32>
      %388 = math.sqrt %384 : vector<1x256xf32>
      %389 = vector.extract_strided_slice %33 {offsets = [13, 0], sizes = [1, 256], strides = [1, 1]} : vector<16x256xf32> to vector<1x256xf32>
      %390 = arith.mulf %388, %389 : vector<1x256xf32>
      %391 = arith.addf %387, %390 : vector<1x256xf32>
      %c13 = arith.constant 13 : index
      %c0_97 = arith.constant 0 : index
      %392 = vector.load %arg8[%c13, %c0_97] : memref<16x256xf32, #tpu.memory_space<vmem>>, vector<1x256xf32>
      tpu.vector_store %arg8[%c13, %c0_97], %391 {strides = array<i32>} : memref<16x256xf32, #tpu.memory_space<vmem>>, vector<1x256xf32>,
      %393 = arith.mulf %16, %372 : vector<1x256xf32>
      %394 = arith.addf %393, %17 : vector<1x256xf32>
      %395 = arith.mulf %365, %365 : vector<1x256xf32>
      %396 = arith.mulf %18, %395 : vector<1x256xf32>
      %397 = arith.addf %394, %396 : vector<1x256xf32>
      %398 = math.tanh %397 : vector<1x256xf32>
      %cst_98 = arith.constant -8.100000e-03 : f32
      %399 = vector.broadcast %cst_98 : f32 to vector<1x256xf32>
      %400 = arith.mulf %399, %398 : vector<1x256xf32>
      %cst_99 = arith.constant 1.006900e+00 : f32
      %401 = vector.broadcast %cst_99 : f32 to vector<1x256xf32>
      %402 = arith.addf %401, %400 : vector<1x256xf32>
      %cst_100 = arith.constant 7.500000e-03 : f32
      %403 = vector.broadcast %cst_100 : f32 to vector<1x256xf32>
      %404 = arith.mulf %403, %398 : vector<1x256xf32>
      %cst_101 = arith.constant 7.500000e-03 : f32
      %405 = vector.broadcast %cst_101 : f32 to vector<1x256xf32>
      %406 = arith.subf %405, %404 : vector<1x256xf32>
      %407 = arith.mulf %14, %398 : vector<1x256xf32>
      %408 = arith.addf %407, %15 : vector<1x256xf32>
      %409 = arith.mulf %408, %398 : vector<1x256xf32>
      %410 = arith.addf %409, %14 : vector<1x256xf32>
      %411 = arith.mulf %402, %391 : vector<1x256xf32>
      %412 = arith.mulf %406, %365 : vector<1x256xf32>
      %413 = arith.subf %411, %412 : vector<1x256xf32>
      %414 = math.sqrt %410 : vector<1x256xf32>
      %415 = vector.extract_strided_slice %33 {offsets = [14, 0], sizes = [1, 256], strides = [1, 1]} : vector<16x256xf32> to vector<1x256xf32>
      %416 = arith.mulf %414, %415 : vector<1x256xf32>
      %417 = arith.addf %413, %416 : vector<1x256xf32>
      %c14 = arith.constant 14 : index
      %c0_102 = arith.constant 0 : index
      %418 = vector.load %arg8[%c14, %c0_102] : memref<16x256xf32, #tpu.memory_space<vmem>>, vector<1x256xf32>
      tpu.vector_store %arg8[%c14, %c0_102], %417 {strides = array<i32>} : memref<16x256xf32, #tpu.memory_space<vmem>>, vector<1x256xf32>,
      %419 = arith.mulf %16, %398 : vector<1x256xf32>
      %420 = arith.addf %419, %17 : vector<1x256xf32>
      %421 = arith.mulf %391, %391 : vector<1x256xf32>
      %422 = arith.mulf %18, %421 : vector<1x256xf32>
      %423 = arith.addf %420, %422 : vector<1x256xf32>
      %424 = math.tanh %423 : vector<1x256xf32>
      %cst_103 = arith.constant -8.100000e-03 : f32
      %425 = vector.broadcast %cst_103 : f32 to vector<1x256xf32>
      %426 = arith.mulf %425, %424 : vector<1x256xf32>
      %cst_104 = arith.constant 1.006900e+00 : f32
      %427 = vector.broadcast %cst_104 : f32 to vector<1x256xf32>
      %428 = arith.addf %427, %426 : vector<1x256xf32>
      %cst_105 = arith.constant 7.500000e-03 : f32
      %429 = vector.broadcast %cst_105 : f32 to vector<1x256xf32>
      %430 = arith.mulf %429, %424 : vector<1x256xf32>
      %cst_106 = arith.constant 7.500000e-03 : f32
      %431 = vector.broadcast %cst_106 : f32 to vector<1x256xf32>
      %432 = arith.subf %431, %430 : vector<1x256xf32>
      %433 = arith.mulf %14, %424 : vector<1x256xf32>
      %434 = arith.addf %433, %15 : vector<1x256xf32>
      %435 = arith.mulf %434, %424 : vector<1x256xf32>
      %436 = arith.addf %435, %14 : vector<1x256xf32>
      %437 = arith.mulf %428, %417 : vector<1x256xf32>
      %438 = arith.mulf %432, %391 : vector<1x256xf32>
      %439 = arith.subf %437, %438 : vector<1x256xf32>
      %440 = math.sqrt %436 : vector<1x256xf32>
      %441 = vector.extract_strided_slice %33 {offsets = [15, 0], sizes = [1, 256], strides = [1, 1]} : vector<16x256xf32> to vector<1x256xf32>
      %442 = arith.mulf %440, %441 : vector<1x256xf32>
      %443 = arith.addf %439, %442 : vector<1x256xf32>
      %c15 = arith.constant 15 : index
      %c0_107 = arith.constant 0 : index
      %444 = vector.load %arg8[%c15, %c0_107] : memref<16x256xf32, #tpu.memory_space<vmem>>, vector<1x256xf32>
      tpu.vector_store %arg8[%c15, %c0_107], %443 {strides = array<i32>} : memref<16x256xf32, #tpu.memory_space<vmem>>, vector<1x256xf32>,
      %445 = arith.mulf %16, %424 : vector<1x256xf32>
      %446 = arith.addf %445, %17 : vector<1x256xf32>
      %447 = arith.mulf %417, %417 : vector<1x256xf32>
      %448 = arith.mulf %18, %447 : vector<1x256xf32>
      %449 = arith.addf %446, %448 : vector<1x256xf32>
      %c0_108 = arith.constant 0 : index
      %c0_109 = arith.constant 0 : index
      %450 = vector.load %arg8[%c0_108, %c0_109] : memref<16x256xf32, #tpu.memory_space<vmem>>, vector<16x256xf32>
      %451 = arith.index_cast %31 : i32 to index
      %c0_110 = arith.constant 0 : index
      %452 = vector.load %arg4[%451, %c0_110] : memref<64x256xf32, #tpu.memory_space<vmem>>, vector<16x256xf32>
      tpu.vector_store %arg4[%451, %c0_110], %450 {strides = array<i32>} : memref<64x256xf32, #tpu.memory_space<vmem>>, vector<16x256xf32>,
      scf.yield %449, %443, %417 : vector<1x256xf32>, vector<1x256xf32>, vector<1x256xf32>
    }
    %c4_i32_16 = arith.constant 4 : i32
    %c0_17 = arith.constant 0 : index
    %c0_18 = arith.constant 0 : index
    %27 = vector.load %arg5[%c0_17, %c0_18] : memref<1x256xf32, #tpu.memory_space<vmem>>, vector<1x256xf32>
    tpu.vector_store %arg5[%c0_17, %c0_18], %26#0 {strides = array<i32>} : memref<1x256xf32, #tpu.memory_space<vmem>>, vector<1x256xf32>,
    %c0_19 = arith.constant 0 : index
    %c0_20 = arith.constant 0 : index
    %28 = vector.load %arg6[%c0_19, %c0_20] : memref<1x256xf32, #tpu.memory_space<vmem>>, vector<1x256xf32>
    tpu.vector_store %arg6[%c0_19, %c0_20], %26#1 {strides = array<i32>} : memref<1x256xf32, #tpu.memory_space<vmem>>, vector<1x256xf32>,
    %c0_21 = arith.constant 0 : index
    %c0_22 = arith.constant 0 : index
    %29 = vector.load %arg7[%c0_21, %c0_22] : memref<1x256xf32, #tpu.memory_space<vmem>>, vector<1x256xf32>
    tpu.vector_store %arg7[%c0_21, %c0_22], %26#2 {strides = array<i32>} : memref<1x256xf32, #tpu.memory_space<vmem>>, vector<1x256xf32>,
    return
  }
  func.func @transform_0(%arg0: i32, %arg1: i32, %arg2: memref<4xf32, #tpu.memory_space<smem>>) -> (i32, i32) {
    %c0_i32 = arith.constant 0 : i32
    return %arg1, %arg0 : i32, i32
  }
  func.func @transform_1(%arg0: i32, %arg1: i32, %arg2: memref<4xf32, #tpu.memory_space<smem>>) -> (i32, i32) {
    %c0_i32 = arith.constant 0 : i32
    return %arg1, %arg0 : i32, i32
  }
}

</mosaic_0001>

<bundles_post_ra>
// kernel: tpu_custom_call.1
= control target key start
LH: loop header
LB: loop body
LE: loop exit
PB: predicated region body
PF: predicated region fallthrough
CT: control target
= control target key end

     0   :  { %s976_s12 = smov [#allocation7]   ;;  %s1341_s0 = inlined_call_operand.hbm [shape: f32[4], index: 0, kind: input, shape index: {}]   ;;  %s1342_s1 = inlined_call_operand.hbm [shape: f32[50,256], index: 1, kind: input, shape index: {}]   ;;  %s1343_s2 = inlined_call_operand.hbm [shape: f32[49,256], index: 2, kind: output, shape index: {}]  }
   0x1   :  { %s8_s11 = sshll.u32 %s1341_s0, 4  ;;  %s9_s11 = int_to_ptr.hbm [resolvable:$true] %s8_s11 }
   0x2   :  { %11 = dma.hbm_to_smem %s9_s11, 16, %s976_s12, [#allocation6] }
   0x3   :  { %954 = dma.done.wait [#allocation6], 16 }
   0x4   :  { %955 = vsyncadd [#allocation6], 4294967280 }
   0x5   :  { %14 = sfence }
   0x6   :  { %15 = vsyncpa [#allocation9], 0 }
   0x7   :  { %16 = vsyncpa [#allocation10], 0 }
   0x8   :  { %20 = vsyncadd [#allocation9], 256  ;;  %s21_s15 = sshll.u32 %s1342_s1, 4  ;;  %s977_s16 = smov [#allocation8]   ;;  %s22_s15 = int_to_ptr.hbm [resolvable:$true] %s21_s15 }
   0x9   :  { %s23_s17 = sshll.u32 %s977_s16, 4  ;;  %s978_s18 = smov 256   ;;  %s24_s17 = int_to_ptr.vmem [resolvable:$true] %s23_s17 }
   0xa   :  { %s979_s19 = smov 16  }
   0xb   :  { %29 = dma.hbm_to_vmem [thread:$0]  %s22_s15, 1792, %s24_s17, [#allocation9], %s978_s18, %s978_s18, %s979_s19  }
   0xc   :  { %956 = dma.done.wait [#allocation9], 2048  }
   0xd   :  { %957 = vsyncadd [#allocation9], 4294965248  ;;  %v56_v0 = vlaneseq  ;;  %s767_s0 = sld [smem:[#allocation7 + $0x1]]  ;;  %v980_v2 = vmov 0.0   ;;  %s1033_s3 = smov 0  }
   0xe   :  { %s768_s20 = sld [smem:[#allocation7 + $0x2]] }
   0xf   :  { %vm1006_vm0 = vcmp.lt.s32.totalorder %v56_v0, 256  ;;  %s769_s1 = sld [smem:[#allocation7 + $0x3]] }
  0x10   :  { %61 = vst.msk [vmem:[#allocation3] sm:$0x3] %vm1006_vm0, %v980_v2  ;;  %s34_s21 = sld [smem:[#allocation7]] }
  0x11   :  { %62 = vst.msk [vmem:[#allocation4] sm:$0x3] %vm1006_vm0, %v980_v2 }
  0x13   :  { %s44_s22 = smul.f32 0.5, %s767_s0 }
  0x14   :  { %s46_s23 = smul.f32 0.5, %s768_s20 }
  0x15   :  { %s38_s24 = smul.f32 0.01, %s769_s1  ;;  %v1014_v3 = vstv %s44_s22 }
  0x16   :  { %v1016_v4 = vstv %s46_s23  ;;  %s45_s25 = smul.f32 0.5, %s34_s21 }
  0x17   :  { %v64_v5 = vld [vmem:[#allocation3] sm:$0x3]   ;;  %s39_s26 = smul.f32 %s38_s24, %s38_s24 }
  0x18   :  { %v65_v6 = vld [vmem:[#allocation4] sm:$0x3]   ;;  %v1018_v7 = vstv %s45_s25 }
  0x19   :  { %s40_s27 = sadd.f32 5.74564e-05, %s39_s26  ;;  %60 = vst.msk [vmem:[#allocation2] sm:$0x3] %vm1006_vm0, %v1018_v7 }
  0x1a   :  { %s42_s28 = ssub.f32 5.74564e-05, %s39_s26 }
  0x1b   :  { %s41_s29 = smul.f32 0.25, %s40_s27 }
  0x1c   :  { %s43_s30 = smul.f32 0.5, %s42_s28 }
  0x1d   :  { %v1023_v8 = vstv %s41_s29 }
  0x1e   :  { %v1025_v9 = vstv %s43_s30 }
  0x20   :  { %v63_v10 = vld [vmem:[#allocation2] sm:$0x3]  }
  0x21 LB: > { %s770_s4 = sshll.u32 %s974_s3, 4  ;;  %814 = vtanh.f32 %v970_v10  ;;  %v125_v11 = vmul.f32 %v966_v5, %v966_v5  ;;  %vm112_vm1 = vcmask 1040384   ;;  %s71_s3 = sadd.s32 1, %s974_s3   ;;  %s974_s3 = sphi %s1033_s3, %s71_s3   ;;  %v970_v10 = vphi %v63_v10, %v1348_v10   ;;  %v966_v5 = vphi %v64_v5, %v1347_v5   ;;  %v962_v6 = vphi %v65_v6, %v1346_v6  }
  0x22   : > { %s1044_s5 = sshra.s32 %s770_s4, 3  ;;  %p68_p0 = scmp.ge.s32.totalorder %s71_s3, 4  }
  0x23   : > { %s774_s6 = sshll.u32 %s1044_s5, 4  ;;  %v126_v17 = vmul.f32 %v125_v11, %v1016_v4 }
  0x24   : > { %s1051_s7 = scalar_lea.vmem [#allocation8], %s774_s6  ;;  %s1219_s8 = scalar_lea.vmem [#allocation11], %s774_s6 }
  0x25   : > { %v1054_v12 = vld [vmem:[%s1051_s7] sm:$0xff]  ;;  %v1058_v13 = vld [vmem:[%s1051_s7 + $0x8] sm:$0xff] }
  0x26   : > { %152 = vst [vmem:[#allocation1] sm:$0xff] %v1054_v12  ;;  %v111_v39 = vrot.slane %v1058_v13, 7 }
  0x27   : > { %v815_v14 = vpop.eup %814  ;;  %153 = vst [vmem:[#allocation1 + $0x9] sm:$0xff] %v1058_v13 }
  0x28   : > { %v90_v15 = vmul.f32 %v815_v14, %v1023_v8  ;;  %v123_v16 = vmul.f32 %v815_v14, %v1014_v3  ;;  %v86_v27 = vmul.f32 -0.0081, %v815_v14  ;;  %v88_v28 = vmul.f32 0.0075, %v815_v14 }
  0x29   : > { %v113_v45 = vsel %vm112_vm1, %v1054_v12, %v111_v39 }
  0x2a   : > { %v91_v18 = vadd.f32 %v90_v15, %v1025_v9  ;;  %v124_v19 = vadd.f32 %v123_v16, %v1018_v7  ;;  %v87_v33 = vadd.f32 1.0069, %v86_v27  ;;  %v89_v34 = vsub.f32 0.0075, %v88_v28 }
  0x2c   : > { %v92_v20 = vmul.f32 %v815_v14, %v91_v18  ;;  %v127_v21 = vadd.f32 %v126_v17, %v124_v19  ;;  %v94_v40 = vmul.f32 %v966_v5, %v87_v33  ;;  %v95_v41 = vmul.f32 %v962_v6, %v89_v34 }
  0x2e   : > { %v1066_v22 = vld [vmem:[#allocation1 + $0x1] ss:$9 sm:$0xff]  ;;  %v93_v23 = vadd.f32 %v92_v20, %v1023_v8  ;;  %816 = vtanh.f32 %v127_v21  ;;  %v96_v47 = vsub.f32 %v94_v40, %v95_v41 }
  0x2f   : > { %191 = vst [vmem:[#allocation1] sm:$0xff] %v1054_v12 }
  0x30   : > { %192 = vst [vmem:[#allocation1 + $0x9] sm:$0xff] %v1058_v13  ;;  %818 = vrsqrt.f32 %v93_v23  ;;  %vm104_vm2 = vcmp.eq.f32.partialorder %v93_v23, inf  ;;  %v107_v43 = vand.u32 2147483648, %v93_v23  ;;  %vm106_vm3 = vcmp.eq.f32.partialorder %v93_v23, 0.0 }
  0x34   : > { %v817_v24 = vpop.eup %816 }
  0x35   : > { %v133_v25 = vmul.f32 %v817_v24, %v1023_v8  ;;  %v129_v50 = vmul.f32 -0.0081, %v817_v24  ;;  %v131_v51 = vmul.f32 0.0075, %v817_v24  ;;  %v162_v54 = vmul.f32 %v817_v24, %v1014_v3 }
  0x36   : > { %v819_v26 = vpop.eup %818 }
  0x37   : > { %v98_v29 = vmul.f32 %v819_v26, %v93_v23  ;;  %v134_v30 = vadd.f32 %v133_v25, %v1025_v9  ;;  %v1074_v37 = vld [vmem:[#allocation1 + $0x2] ss:$9 sm:$0xff]  ;;  %v130_v58 = vadd.f32 1.0069, %v129_v50  ;;  %v132_v59 = vsub.f32 0.0075, %v131_v51 }
  0x38   : > { %230 = vst [vmem:[#allocation1] sm:$0xff] %v1054_v12  ;;  %v163_v61 = vadd.f32 %v162_v54, %v1018_v7 }
  0x39   : > { %v99_v31 = vmul.f32 %v819_v26, %v98_v29  ;;  %v135_v32 = vmul.f32 %v817_v24, %v134_v30  ;;  %231 = vst [vmem:[#allocation1 + $0x9] sm:$0xff] %v1058_v13  ;;  %v138_v6 = vmul.f32 %v966_v5, %v132_v59 }
  0x3b   : > { %v100_v35 = vmul.f32 0.5, %v99_v31  ;;  %v136_v36 = vadd.f32 %v135_v32, %v1023_v8 }
  0x3d   : > { %v101_v38 = vsub.f32 1.5, %v100_v35  ;;  %820 = vrsqrt.f32 %v136_v36  ;;  %vm147_vm4 = vcmp.eq.f32.partialorder %v136_v36, inf  ;;  %v150_v11 = vand.u32 2147483648, %v136_v36 }
  0x3e   : > { %vm149_vm5 = vcmp.eq.f32.partialorder %v136_v36, 0.0 }
  0x3f   : > { %v102_v42 = vmul.f32 %v819_v26, %v101_v38 }
  0x40   : > { %v1083_v55 = vld [vmem:[#allocation1 + $0x3] ss:$9 sm:$0xff] }
  0x41   : > { %v103_v44 = vmul.f32 %v102_v42, %v93_v23  ;;  %269 = vst [vmem:[#allocation1] sm:$0xff] %v1054_v12 }
  0x42   : > { %270 = vst [vmem:[#allocation1 + $0x9] sm:$0xff] %v1058_v13 }
  0x43   : > { %v821_v46 = vpop.eup %820  ;;  %v105_v48 = vsel %vm104_vm2, %v93_v23, %v103_v44 }
  0x44   : > { %v108_v49 = vsel %vm106_vm3, %v107_v43, %v105_v48  ;;  %v141_v52 = vmul.f32 %v821_v46, %v136_v36 }
  0x45   : > { %v115_v53 = vmul.f32 %v113_v45, %v108_v49 }
  0x46   : > { %v142_v56 = vmul.f32 %v821_v46, %v141_v52 }
  0x47   : > { %v116_v57 = vadd.f32 %v115_v53, %v96_v47 }
  0x48   : > { %v143_v60 = vmul.f32 0.5, %v142_v56 }
  0x49   : > { %v164_v62 = vmul.f32 %v116_v57, %v116_v57  ;;  %121 = vst.msk [vmem:[#allocation5] ss:$8 sm:$0x3] %vm1006_vm0, %v116_v57  ;;  %v137_v2 = vmul.f32 %v130_v58, %v116_v57  ;;  %v1106_v30 = vld [vmem:[#allocation1 + $0x4] ss:$9 sm:$0xff] }
  0x4a   : > { %v144_v63 = vsub.f32 1.5, %v143_v60  ;;  %308 = vst [vmem:[#allocation1] sm:$0xff] %v1054_v12 }
  0x4b   : > { %v165_v0 = vmul.f32 %v164_v62, %v1016_v4  ;;  %v139_v16 = vsub.f32 %v137_v2, %v138_v6  ;;  %309 = vst [vmem:[#allocation1 + $0x9] sm:$0xff] %v1058_v13  ;;  %v1132_v2 = vld [vmem:[%s1051_s7 + $0x10] sm:$0xff] }
  0x4c   : > { %v145_v10 = vmul.f32 %v821_v46, %v144_v63 }
  0x4d   : > { %v166_v14 = vadd.f32 %v165_v0, %v163_v61 }
  0x4e   : > { %v146_v15 = vmul.f32 %v145_v10, %v136_v36 }
  0x4f   : > { %822 = vtanh.f32 %v166_v14 }
  0x50   : > { %v148_v17 = vsel %vm147_vm4, %v136_v36, %v146_v15 }
  0x51   : > { %v151_v18 = vsel %vm149_vm5, %v150_v11, %v148_v17 }
  0x52   : > { %v157_v19 = vmul.f32 %v1066_v22, %v151_v18  ;;  %v1111_v35 = vld [vmem:[#allocation1 + $0x5] ss:$9 sm:$0xff] }
  0x53   : > { %347 = vst [vmem:[#allocation1] sm:$0xff] %v1054_v12 }
  0x54   : > { %v1093_v20 = vadd.f32 %v157_v19, %v139_v16  ;;  %348 = vst [vmem:[#allocation1 + $0x9] sm:$0xff] %v1058_v13 }
  0x55   : > { %v823_v21 = vpop.eup %822 }
  0x56   : > { %160 = vst.msk [vmem:[#allocation5 + $0x1] ss:$8 sm:$0x3] %vm1006_vm0, %v1093_v20  ;;  %v201_v5 = vmul.f32 %v823_v21, %v1014_v3  ;;  %v203_v23 = vmul.f32 %v1093_v20, %v1093_v20  ;;  %v172_v24 = vmul.f32 %v823_v21, %v1023_v8  ;;  %v168_v38 = vmul.f32 -0.0081, %v823_v21 }
  0x57   : > { %v170_v39 = vmul.f32 0.0075, %v823_v21 }
  0x58   : > { %v202_v25 = vadd.f32 %v201_v5, %v1018_v7  ;;  %v204_v26 = vmul.f32 %v203_v23, %v1016_v4  ;;  %v173_v22 = vadd.f32 %v172_v24, %v1025_v9  ;;  %v169_v44 = vadd.f32 1.0069, %v168_v38 }
  0x59   : > { %v171_v45 = vsub.f32 0.0075, %v170_v39 }
  0x5a   : > { %v205_v27 = vadd.f32 %v204_v26, %v202_v25  ;;  %v174_v28 = vmul.f32 %v823_v21, %v173_v22  ;;  %v176_v49 = vmul.f32 %v169_v44, %v1093_v20 }
  0x5b   : > { %v177_v50 = vmul.f32 %v171_v45, %v116_v57  ;;  %v1118_v52 = vld [vmem:[#allocation1 + $0x6] ss:$9 sm:$0xff] }
  0x5c   : > { %824 = vtanh.f32 %v205_v27  ;;  %v175_v29 = vadd.f32 %v174_v28, %v1023_v8  ;;  %386 = vst [vmem:[#allocation1] sm:$0xff] %v1054_v12 }
  0x5d   : > { %387 = vst [vmem:[#allocation1 + $0x9] sm:$0xff] %v1058_v13  ;;  %v178_v58 = vsub.f32 %v176_v49, %v177_v50 }
  0x5e   : > { %826 = vrsqrt.f32 %v175_v29  ;;  %vm186_vm6 = vcmp.eq.f32.partialorder %v175_v29, inf  ;;  %v189_v48 = vand.u32 2147483648, %v175_v29  ;;  %vm188_vm7 = vcmp.eq.f32.partialorder %v175_v29, 0.0 }
  0x62   : > { %v825_v31 = vpop.eup %824 }
  0x63   : > { %v211_v32 = vmul.f32 %v825_v31, %v1023_v8  ;;  %v240_v57 = vmul.f32 %v825_v31, %v1014_v3  ;;  %v207_v63 = vmul.f32 -0.0081, %v825_v31  ;;  %v209_v13 = vmul.f32 0.0075, %v825_v31 }
  0x64   : > { %v827_v33 = vpop.eup %826  ;;  %v1134_v6 = vld [vmem:[#allocation1 + $0x7] ss:$9 sm:$0xff] }
  0x65   : > { %v180_v34 = vmul.f32 %v827_v33, %v175_v29  ;;  %v212_v36 = vadd.f32 %v211_v32, %v1025_v9  ;;  %v241_v10 = vadd.f32 %v240_v57, %v1018_v7  ;;  %464 = vst [vmem:[#allocation1] sm:$0xff] %v1132_v2  ;;  %v208_v16 = vadd.f32 1.0069, %v207_v63 }
  0x66   : > { %v210_v17 = vsub.f32 0.0075, %v209_v13 }
  0x67   : > { %v181_v40 = vmul.f32 %v827_v33, %v180_v34  ;;  %v213_v41 = vmul.f32 %v825_v31, %v212_v36 }
  0x68   : > { %v216_v23 = vmul.f32 %v210_v17, %v1093_v20 }
  0x69   : > { %v182_v42 = vmul.f32 0.5, %v181_v40  ;;  %v214_v43 = vadd.f32 %v213_v41, %v1023_v8 }
  0x6b   : > { %v183_v46 = vsub.f32 1.5, %v182_v42  ;;  %828 = vrsqrt.f32 %v214_v43  ;;  %vm225_vm8 = vcmp.eq.f32.partialorder %v214_v43, inf  ;;  %v228_v5 = vand.u32 2147483648, %v214_v43 }
  0x6c   : > { %vm227_vm9 = vcmp.eq.f32.partialorder %v214_v43, 0.0 }
  0x6d   : > { %v184_v47 = vmul.f32 %v827_v33, %v183_v46 }
  0x6f   : > { %v185_v51 = vmul.f32 %v184_v47, %v175_v29 }
  0x71   : > { %v187_v53 = vsel %vm186_vm6, %v175_v29, %v185_v51  ;;  %v829_v54 = vpop.eup %828 }
  0x72   : > { %v190_v56 = vsel %vm188_vm7, %v189_v48, %v187_v53  ;;  %v219_v60 = vmul.f32 %v829_v54, %v214_v43 }
  0x73   : > { %v196_v59 = vmul.f32 %v1074_v37, %v190_v56  ;;  %v1137_v37 = vld [vmem:[%s1051_s7 + $0x18] sm:$0xff] }
  0x74   : > { %v220_v62 = vmul.f32 %v829_v54, %v219_v60  ;;  %465 = vst [vmem:[#allocation1 + $0x9] sm:$0xff] %v1137_v37 }
  0x75   : > { %v1123_v61 = vadd.f32 %v196_v59, %v178_v58 }
  0x76   : > { %v221_v0 = vmul.f32 0.5, %v220_v62 }
  0x77   : > { %199 = vst.msk [vmem:[#allocation5 + $0x2] ss:$8 sm:$0x3] %vm1006_vm0, %v1123_v61  ;;  %v242_v12 = vmul.f32 %v1123_v61, %v1123_v61  ;;  %v215_v19 = vmul.f32 %v208_v16, %v1123_v61 }
  0x78   : > { %v222_v14 = vsub.f32 1.5, %v221_v0 }
  0x79   : > { %v243_v11 = vmul.f32 %v242_v12, %v1016_v4  ;;  %v217_v26 = vsub.f32 %v215_v19, %v216_v23 }
  0x7a   : > { %v223_v18 = vmul.f32 %v829_v54, %v222_v14 }
  0x7b   : > { %v244_v15 = vadd.f32 %v243_v11, %v241_v10  ;;  %v1159_v39 = vld [vmem:[#allocation1 + $0x1] ss:$9 sm:$0xff] }
  0x7c   : > { %v224_v21 = vmul.f32 %v223_v18, %v214_v43  ;;  %503 = vst [vmem:[#allocation1] sm:$0xff] %v1132_v2 }
  0x7d   : > { %830 = vtanh.f32 %v244_v15  ;;  %504 = vst [vmem:[#allocation1 + $0x9] sm:$0xff] %v1137_v37 }
  0x7e   : > { %v226_v24 = vsel %vm225_vm8, %v214_v43, %v224_v21 }
  0x7f   : > { %v229_v25 = vsel %vm227_vm9, %v228_v5, %v226_v24 }
  0x80   : > { %v235_v22 = vmul.f32 %v1083_v55, %v229_v25 }
  0x82   : > { %v1146_v28 = vadd.f32 %v235_v22, %v217_v26 }
  0x83   : > { %v831_v27 = vpop.eup %830 }
  0x84   : > { %v279_v29 = vmul.f32 %v831_v27, %v1014_v3  ;;  %v250_v31 = vmul.f32 %v831_v27, %v1023_v8  ;;  %238 = vst.msk [vmem:[#allocation5 + $0x3] ss:$8 sm:$0x3] %vm1006_vm0, %v1146_v28  ;;  %v281_v20 = vmul.f32 %v1146_v28, %v1146_v28  ;;  %v1164_v44 = vld [vmem:[#allocation1 + $0x2] ss:$9 sm:$0xff] }
  0x85   : > { %v246_v46 = vmul.f32 -0.0081, %v831_v27  ;;  %v248_v47 = vmul.f32 0.0075, %v831_v27  ;;  %542 = vst [vmem:[#allocation1] sm:$0xff] %v1132_v2 }
  0x86   : > { %v280_v32 = vadd.f32 %v279_v29, %v1018_v7  ;;  %v251_v33 = vadd.f32 %v250_v31, %v1025_v9  ;;  %v282_v55 = vmul.f32 %v281_v20, %v1016_v4  ;;  %543 = vst [vmem:[#allocation1 + $0x9] sm:$0xff] %v1137_v37 }
  0x87   : > { %v247_v53 = vadd.f32 1.0069, %v246_v46  ;;  %v249_v54 = vsub.f32 0.0075, %v248_v47 }
  0x88   : > { %v252_v34 = vmul.f32 %v831_v27, %v251_v33  ;;  %v283_v36 = vadd.f32 %v282_v55, %v280_v32 }
  0x89   : > { %v254_v59 = vmul.f32 %v247_v53, %v1146_v28  ;;  %v255_v60 = vmul.f32 %v249_v54, %v1123_v61 }
  0x8a   : > { %v253_v38 = vadd.f32 %v252_v34, %v1023_v8  ;;  %832 = vtanh.f32 %v283_v36 }
  0x8b   : > { %v256_v0 = vsub.f32 %v254_v59, %v255_v60 }
  0x8c   : > { %834 = vrsqrt.f32 %v253_v38  ;;  %vm264_vm10 = vcmp.eq.f32.partialorder %v253_v38, inf  ;;  %v267_v62 = vand.u32 2147483648, %v253_v38  ;;  %vm266_vm11 = vcmp.eq.f32.partialorder %v253_v38, 0.0 }
  0x90   : > { %v833_v40 = vpop.eup %832 }
  0x91   : > { %v289_v42 = vmul.f32 %v833_v40, %v1023_v8  ;;  %v318_v15 = vmul.f32 %v833_v40, %v1014_v3  ;;  %v285_v17 = vmul.f32 -0.0081, %v833_v40  ;;  %v287_v18 = vmul.f32 0.0075, %v833_v40 }
  0x92   : > { %v835_v41 = vpop.eup %834 }
  0x93   : > { %v258_v43 = vmul.f32 %v835_v41, %v253_v38  ;;  %v290_v45 = vadd.f32 %v289_v42, %v1025_v9  ;;  %v319_v21 = vadd.f32 %v318_v15, %v1018_v7  ;;  %v286_v25 = vadd.f32 1.0069, %v285_v17 }
  0x95   : > { %v259_v48 = vmul.f32 %v835_v41, %v258_v43  ;;  %v291_v49 = vmul.f32 %v833_v40, %v290_v45 }
  0x97   : > { %v260_v50 = vmul.f32 0.5, %v259_v48  ;;  %v292_v51 = vadd.f32 %v291_v49, %v1023_v8 }
  0x99   : > { %v261_v56 = vsub.f32 1.5, %v260_v50  ;;  %836 = vrsqrt.f32 %v292_v51  ;;  %vm303_vm12 = vcmp.eq.f32.partialorder %v292_v51, inf  ;;  %v306_v29 = vand.u32 2147483648, %v292_v51 }
  0x9a   : > { %vm305_vm13 = vcmp.eq.f32.partialorder %v292_v51, 0.0 }
  0x9b   : > { %v262_v58 = vmul.f32 %v835_v41, %v261_v56 }
  0x9d   : > { %v263_v57 = vmul.f32 %v262_v58, %v253_v38 }
  0x9f   : > { %v265_v63 = vsel %vm264_vm10, %v253_v38, %v263_v57  ;;  %v837_v12 = vpop.eup %836 }
  0xa0   : > { %v268_v13 = vsel %vm266_vm11, %v267_v62, %v265_v63  ;;  %v297_v11 = vmul.f32 %v837_v12, %v292_v51 }
  0xa1   : > { %v274_v10 = vmul.f32 %v1106_v30, %v268_v13  ;;  %v288_v30 = vsub.f32 0.0075, %v287_v18 }
  0xa2   : > { %v298_v16 = vmul.f32 %v837_v12, %v297_v11 }
  0xa3   : > { %v275_v14 = vadd.f32 %v274_v10, %v256_v0  ;;  %v294_v31 = vmul.f32 %v288_v30, %v1146_v28 }
  0xa4   : > { %v299_v19 = vmul.f32 0.5, %v298_v16 }
  0xa5   : > { %277 = vst.msk [vmem:[#allocation5 + $0x4] ss:$8 sm:$0x3] %vm1006_vm0, %v275_v14  ;;  %v320_v61 = vmul.f32 %v275_v14, %v275_v14  ;;  %v293_v22 = vmul.f32 %v286_v25, %v275_v14 }
  0xa6   : > { %v300_v23 = vsub.f32 1.5, %v299_v19 }
  0xa7   : > { %v321_v5 = vmul.f32 %v320_v61, %v1016_v4  ;;  %v295_v33 = vsub.f32 %v293_v22, %v294_v31 }
  0xa8   : > { %v301_v26 = vmul.f32 %v837_v12, %v300_v23 }
  0xa9   : > { %v322_v24 = vadd.f32 %v321_v5, %v319_v21 }
  0xaa   : > { %v302_v27 = vmul.f32 %v301_v26, %v292_v51 }
  0xab   : > { %838 = vtanh.f32 %v322_v24 }
  0xac   : > { %v304_v20 = vsel %vm303_vm12, %v292_v51, %v302_v27 }
  0xad   : > { %v307_v32 = vsel %vm305_vm13, %v306_v29, %v304_v20 }
  0xae   : > { %v313_v55 = vmul.f32 %v1111_v35, %v307_v32 }
  0xb0   : > { %v314_v36 = vadd.f32 %v313_v55, %v295_v33 }
  0xb1   : > { %v839_v34 = vpop.eup %838 }
  0xb2   : > { %v357_v38 = vmul.f32 %v839_v34, %v1014_v3  ;;  %v328_v40 = vmul.f32 %v839_v34, %v1023_v8  ;;  %316 = vst.msk [vmem:[#allocation5 + $0x5] ss:$8 sm:$0x3] %vm1006_vm0, %v314_v36  ;;  %v359_v41 = vmul.f32 %v314_v36, %v314_v36  ;;  %v324_v53 = vmul.f32 -0.0081, %v839_v34 }
  0xb3   : > { %v326_v54 = vmul.f32 0.0075, %v839_v34 }
  0xb4   : > { %v358_v42 = vadd.f32 %v357_v38, %v1018_v7  ;;  %v329_v28 = vadd.f32 %v328_v40, %v1025_v9  ;;  %v360_v43 = vmul.f32 %v359_v41, %v1016_v4  ;;  %v325_v57 = vadd.f32 1.0069, %v324_v53 }
  0xb5   : > { %v327_v62 = vsub.f32 0.0075, %v326_v54 }
  0xb6   : > { %v330_v45 = vmul.f32 %v839_v34, %v329_v28  ;;  %v361_v46 = vadd.f32 %v360_v43, %v358_v42  ;;  %v332_v13 = vmul.f32 %v325_v57, %v314_v36 }
  0xb7   : > { %v333_v0 = vmul.f32 %v327_v62, %v275_v14 }
  0xb8   : > { %v331_v35 = vadd.f32 %v330_v45, %v1023_v8  ;;  %840 = vtanh.f32 %v361_v46 }
  0xb9   : > { %v334_v61 = vsub.f32 %v332_v13, %v333_v0 }
  0xba   : > { %842 = vrsqrt.f32 %v331_v35  ;;  %vm342_vm14 = vcmp.eq.f32.partialorder %v331_v35, inf  ;;  %v345_v11 = vand.u32 2147483648, %v331_v35  ;;  %vm344_vm15 = vcmp.eq.f32.partialorder %v331_v35, 0.0 }
  0xbe   : > { %v841_v47 = vpop.eup %840 }
  0xbf   : > { %v367_v49 = vmul.f32 %v841_v47, %v1023_v8  ;;  %v396_v5 = vmul.f32 %v841_v47, %v1014_v3  ;;  %v363_v24 = vmul.f32 -0.0081, %v841_v47  ;;  %v365_v25 = vmul.f32 0.0075, %v841_v47 }
  0xc0   : > { %v843_v48 = vpop.eup %842 }
  0xc1   : > { %v336_v50 = vmul.f32 %v843_v48, %v331_v35  ;;  %v368_v51 = vadd.f32 %v367_v49, %v1025_v9  ;;  %v397_v26 = vadd.f32 %v396_v5, %v1018_v7  ;;  %v364_v29 = vadd.f32 1.0069, %v363_v24 }
  0xc2   : > { %v366_v31 = vsub.f32 0.0075, %v365_v25 }
  0xc3   : > { %v337_v56 = vmul.f32 %v843_v48, %v336_v50  ;;  %v369_v58 = vmul.f32 %v841_v47, %v368_v51 }
  0xc4   : > { %v372_v34 = vmul.f32 %v366_v31, %v314_v36 }
  0xc5   : > { %v338_v59 = vmul.f32 0.5, %v337_v56  ;;  %v370_v60 = vadd.f32 %v369_v58, %v1023_v8 }
  0xc7   : > { %v339_v63 = vsub.f32 1.5, %v338_v59  ;;  %844 = vrsqrt.f32 %v370_v60  ;;  %vm381_vm2 = vcmp.eq.f32.partialorder %v370_v60, inf  ;;  %v384_v55 = vand.u32 2147483648, %v370_v60 }
  0xc8   : > { %vm383_vm3 = vcmp.eq.f32.partialorder %v370_v60, 0.0 }
  0xc9   : > { %v340_v12 = vmul.f32 %v843_v48, %v339_v63 }
  0xcb   : > { %v341_v10 = vmul.f32 %v340_v12, %v331_v35 }
  0xcd   : > { %v343_v15 = vsel %vm342_vm14, %v331_v35, %v341_v10  ;;  %v845_v16 = vpop.eup %844 }
  0xce   : > { %v346_v17 = vsel %vm344_vm15, %v345_v11, %v343_v15  ;;  %v375_v19 = vmul.f32 %v845_v16, %v370_v60 }
  0xcf   : > { %v352_v18 = vmul.f32 %v1118_v52, %v346_v17 }
  0xd0   : > { %v376_v23 = vmul.f32 %v845_v16, %v375_v19 }
  0xd1   : > { %v1192_v21 = vadd.f32 %v352_v18, %v334_v61 }
  0xd2   : > { %v377_v30 = vmul.f32 0.5, %v376_v23 }
  0xd3   : > { %355 = vst.msk [vmem:[#allocation5 + $0x6] ss:$8 sm:$0x3] %vm1006_vm0, %v1192_v21  ;;  %v398_v14 = vmul.f32 %v1192_v21, %v1192_v21  ;;  %v371_v32 = vmul.f32 %v364_v29, %v1192_v21 }
  0xd4   : > { %v378_v22 = vsub.f32 1.5, %v377_v30 }
  0xd5   : > { %v399_v52 = vmul.f32 %v398_v14, %v1016_v4  ;;  %v373_v41 = vsub.f32 %v371_v32, %v372_v34 }
  0xd6   : > { %v379_v20 = vmul.f32 %v845_v16, %v378_v22  ;;  %v427_v16 = vrot.slane %v1137_v37, 7 }
  0xd7   : > { %v400_v27 = vadd.f32 %v399_v52, %v397_v26 }
  0xd8   : > { %v380_v33 = vmul.f32 %v379_v20, %v370_v60  ;;  %v428_v23 = vsel %vm112_vm1, %v1132_v2, %v427_v16 }
  0xd9   : > { %846 = vtanh.f32 %v400_v27 }
  0xda   : > { %v382_v38 = vsel %vm381_vm2, %v370_v60, %v380_v33 }
  0xdb   : > { %v385_v40 = vsel %vm383_vm3, %v384_v55, %v382_v38 }
  0xdc   : > { %v391_v42 = vmul.f32 %v1134_v6, %v385_v40 }
  0xde   : > { %v1204_v43 = vadd.f32 %v391_v42, %v373_v41 }
  0xdf   : > { %v847_v28 = vpop.eup %846 }
  0xe0   : > { %v435_v45 = vmul.f32 %v847_v28, %v1014_v3  ;;  %v406_v46 = vmul.f32 %v847_v28, %v1023_v8  ;;  %394 = vst.msk [vmem:[#allocation5 + $0x7] ss:$8 sm:$0x3] %vm1006_vm0, %v1204_v43  ;;  %v437_v36 = vmul.f32 %v1204_v43, %v1204_v43  ;;  %v402_v57 = vmul.f32 -0.0081, %v847_v28 }
  0xe1   : > { %v404_v62 = vmul.f32 0.0075, %v847_v28 }
  0xe2   : > { %v436_v35 = vadd.f32 %v435_v45, %v1018_v7  ;;  %v407_v47 = vadd.f32 %v406_v46, %v1025_v9  ;;  %v438_v6 = vmul.f32 %v437_v36, %v1016_v4  ;;  %v403_v10 = vadd.f32 1.0069, %v402_v57  ;;  %v545_v57 = vld [vmem:[#allocation1 + $0x3] ss:$9 sm:$0xff] }
  0xe3   : > { %v405_v11 = vsub.f32 0.0075, %v404_v62  ;;  %581 = vst [vmem:[#allocation1] sm:$0xff] %v1132_v2 }
  0xe4   : > { %v408_v48 = vmul.f32 %v847_v28, %v407_v47  ;;  %v439_v49 = vadd.f32 %v438_v6, %v436_v35  ;;  %v410_v61 = vmul.f32 %v403_v10, %v1204_v43  ;;  %582 = vst [vmem:[#allocation1 + $0x9] sm:$0xff] %v1137_v37 }
  0xe5   : > { %v411_v18 = vmul.f32 %v405_v11, %v1192_v21 }
  0xe6   : > { %v409_v50 = vadd.f32 %v408_v48, %v1023_v8  ;;  %848 = vtanh.f32 %v439_v49 }
  0xe7   : > { %v713_v51 = vld [vmem:[#allocation5] sm:$0xff]  ;;  %v714_v53 = vld [vmem:[#allocation5 + $0x8] sm:$0xff]  ;;  %v412_v30 = vsub.f32 %v410_v61, %v411_v18 }
  0xe8   : > { %850 = vrsqrt.f32 %v409_v50  ;;  %719 = vst [vmem:[%s1219_s8] sm:$0xff] %v713_v51  ;;  %vm420_vm4 = vcmp.eq.f32.partialorder %v409_v50, inf  ;;  %v423_v5 = vand.u32 2147483648, %v409_v50  ;;  %vm422_vm5 = vcmp.eq.f32.partialorder %v409_v50, 0.0 }
  0xe9   : > { %720 = vst [vmem:[%s1219_s8 + $0x8] sm:$0xff] %v714_v53 }
  0xec   : > { %v849_v54 = vpop.eup %848 }
  0xed   : > { %v445_v58 = vmul.f32 %v849_v54, %v1023_v8  ;;  %v474_v27 = vmul.f32 %v849_v54, %v1014_v3  ;;  %v441_v31 = vmul.f32 -0.0081, %v849_v54  ;;  %v443_v20 = vmul.f32 0.0075, %v849_v54 }
  0xee   : > { %v851_v56 = vpop.eup %850 }
  0xef   : > { %v414_v59 = vmul.f32 %v851_v56, %v409_v50  ;;  %v446_v60 = vadd.f32 %v445_v58, %v1025_v9  ;;  %v475_v33 = vadd.f32 %v474_v27, %v1018_v7  ;;  %v442_v40 = vadd.f32 1.0069, %v441_v31 }
  0xf0   : > { %v444_v41 = vsub.f32 0.0075, %v443_v20 }
  0xf1   : > { %v415_v63 = vmul.f32 %v851_v56, %v414_v59  ;;  %v447_v12 = vmul.f32 %v849_v54, %v446_v60 }
  0xf2   : > { %v450_v36 = vmul.f32 %v444_v41, %v1204_v43 }
  0xf3   : > { %v416_v13 = vmul.f32 0.5, %v415_v63  ;;  %v448_v0 = vadd.f32 %v447_v12, %v1023_v8 }
  0xf5   : > { %v417_v15 = vsub.f32 1.5, %v416_v13  ;;  %852 = vrsqrt.f32 %v448_v0  ;;  %vm459_vm1 = vcmp.eq.f32.partialorder %v448_v0, inf  ;;  %v462_v46 = vand.u32 2147483648, %v448_v0 }
  0xf6   : > { %vm461_vm6 = vcmp.eq.f32.partialorder %v448_v0, 0.0 }
  0xf7   : > { %v418_v17 = vmul.f32 %v851_v56, %v417_v15 }
  0xf9   : > { %v419_v19 = vmul.f32 %v418_v17, %v409_v50 }
  0xfb   : > { %v421_v24 = vsel %vm420_vm4, %v409_v50, %v419_v19  ;;  %v853_v14 = vpop.eup %852 }
  0xfc   : > { %v424_v25 = vsel %vm422_vm5, %v423_v5, %v421_v24  ;;  %v453_v52 = vmul.f32 %v853_v14, %v448_v0 }
  0xfd   : > { %v430_v26 = vmul.f32 %v428_v23, %v424_v25 }
  0xfe   : > { %v454_v29 = vmul.f32 %v853_v14, %v453_v52 }
  0xff   : > { %v431_v22 = vadd.f32 %v430_v26, %v412_v30 }
 0x100   : > { %v455_v32 = vmul.f32 0.5, %v454_v29 }
 0x101   : > { %433 = vst.msk [vmem:[#allocation5 + $0x10] ss:$8 sm:$0x3] %vm1006_vm0, %v431_v22  ;;  %v476_v21 = vmul.f32 %v431_v22, %v431_v22  ;;  %v449_v28 = vmul.f32 %v442_v40, %v431_v22 }
 0x102   : > { %v456_v34 = vsub.f32 1.5, %v455_v32 }
 0x103   : > { %v477_v55 = vmul.f32 %v476_v21, %v1016_v4  ;;  %v451_v6 = vsub.f32 %v449_v28, %v450_v36 }
 0x104   : > { %v457_v42 = vmul.f32 %v853_v14, %v456_v34 }
 0x105   : > { %v478_v38 = vadd.f32 %v477_v55, %v475_v33 }
 0x106   : > { %v458_v45 = vmul.f32 %v457_v42, %v448_v0 }
 0x107   : > { %854 = vtanh.f32 %v478_v38 }
 0x108   : > { %v460_v35 = vsel %vm459_vm1, %v448_v0, %v458_v45 }
 0x109   : > { %v463_v47 = vsel %vm461_vm6, %v462_v46, %v460_v35 }
 0x10a   : > { %v469_v48 = vmul.f32 %v1159_v39, %v463_v47 }
 0x10c   : > { %v1238_v50 = vadd.f32 %v469_v48, %v451_v6 }
 0x10d   : > { %v855_v49 = vpop.eup %854 }
 0x10e   : > { %v513_v51 = vmul.f32 %v855_v49, %v1014_v3  ;;  %v484_v53 = vmul.f32 %v855_v49, %v1023_v8  ;;  %472 = vst.msk [vmem:[#allocation5 + $0x11] ss:$8 sm:$0x3] %vm1006_vm0, %v1238_v50  ;;  %v515_v43 = vmul.f32 %v1238_v50, %v1238_v50  ;;  %v480_v10 = vmul.f32 -0.0081, %v855_v49 }
 0x10f   : > { %v482_v11 = vmul.f32 0.0075, %v855_v49 }
 0x110   : > { %v514_v54 = vadd.f32 %v513_v51, %v1018_v7  ;;  %v485_v56 = vadd.f32 %v484_v53, %v1025_v9  ;;  %v516_v39 = vmul.f32 %v515_v43, %v1016_v4  ;;  %v481_v18 = vadd.f32 1.0069, %v480_v10  ;;  %v584_v51 = vld [vmem:[#allocation1 + $0x4] ss:$9 sm:$0xff] }
 0x111   : > { %v483_v19 = vsub.f32 0.0075, %v482_v11  ;;  %620 = vst [vmem:[#allocation1] sm:$0xff] %v1132_v2 }
 0x112   : > { %v486_v58 = vmul.f32 %v855_v49, %v485_v56  ;;  %v517_v59 = vadd.f32 %v516_v39, %v514_v54  ;;  %v488_v24 = vmul.f32 %v481_v18, %v1238_v50  ;;  %621 = vst [vmem:[#allocation1 + $0x9] sm:$0xff] %v1137_v37 }
 0x113   : > { %v489_v14 = vmul.f32 %v483_v19, %v431_v22 }
 0x114   : > { %v487_v60 = vadd.f32 %v486_v58, %v1023_v8  ;;  %856 = vtanh.f32 %v517_v59 }
 0x115   : > { %v490_v29 = vsub.f32 %v488_v24, %v489_v14 }
 0x116   : > { %858 = vrsqrt.f32 %v487_v60  ;;  %vm498_vm7 = vcmp.eq.f32.partialorder %v487_v60, inf  ;;  %v501_v30 = vand.u32 2147483648, %v487_v60  ;;  %vm500_vm8 = vcmp.eq.f32.partialorder %v487_v60, 0.0 }
 0x11a   : > { %v857_v62 = vpop.eup %856 }
 0x11b   : > { %v523_v12 = vmul.f32 %v857_v62, %v1023_v8  ;;  %v552_v32 = vmul.f32 %v857_v62, %v1014_v3  ;;  %v519_v55 = vmul.f32 -0.0081, %v857_v62  ;;  %v521_v34 = vmul.f32 0.0075, %v857_v62 }
 0x11c   : > { %v859_v63 = vpop.eup %858 }
 0x11d   : > { %v492_v13 = vmul.f32 %v859_v63, %v487_v60  ;;  %v524_v0 = vadd.f32 %v523_v12, %v1025_v9  ;;  %v553_v40 = vadd.f32 %v552_v32, %v1018_v7  ;;  %v520_v28 = vadd.f32 1.0069, %v519_v55 }
 0x11e   : > { %v522_v45 = vsub.f32 0.0075, %v521_v34 }
 0x11f   : > { %v493_v15 = vmul.f32 %v859_v63, %v492_v13  ;;  %v525_v16 = vmul.f32 %v857_v62, %v524_v0  ;;  %v623_v13 = vld [vmem:[#allocation1 + $0x5] ss:$9 sm:$0xff] }
 0x120   : > { %v528_v6 = vmul.f32 %v522_v45, %v1238_v50  ;;  %659 = vst [vmem:[#allocation1] sm:$0xff] %v1132_v2 }
 0x121   : > { %v494_v17 = vmul.f32 0.5, %v493_v15  ;;  %v526_v61 = vadd.f32 %v525_v16, %v1023_v8  ;;  %660 = vst [vmem:[#allocation1 + $0x9] sm:$0xff] %v1137_v37 }
 0x123   : > { %v495_v5 = vsub.f32 1.5, %v494_v17  ;;  %860 = vrsqrt.f32 %v526_v61  ;;  %vm537_vm9 = vcmp.eq.f32.partialorder %v526_v61, inf  ;;  %v540_v47 = vand.u32 2147483648, %v526_v61 }
 0x124   : > { %vm539_vm10 = vcmp.eq.f32.partialorder %v526_v61, 0.0 }
 0x125   : > { %v496_v23 = vmul.f32 %v859_v63, %v495_v5 }
 0x127   : > { %v497_v25 = vmul.f32 %v496_v23, %v487_v60 }
 0x129   : > { %v499_v26 = vsel %vm498_vm7, %v487_v60, %v497_v25  ;;  %v861_v52 = vpop.eup %860 }
 0x12a   : > { %v502_v27 = vsel %vm500_vm8, %v501_v30, %v499_v26  ;;  %v531_v21 = vmul.f32 %v861_v52, %v526_v61 }
 0x12b   : > { %v508_v31 = vmul.f32 %v1164_v44, %v502_v27 }
 0x12c   : > { %v532_v33 = vmul.f32 %v861_v52, %v531_v21 }
 0x12d   : > { %v1258_v20 = vadd.f32 %v508_v31, %v490_v29 }
 0x12e   : > { %v533_v38 = vmul.f32 0.5, %v532_v33 }
 0x12f   : > { %511 = vst.msk [vmem:[#allocation5 + $0x12] ss:$8 sm:$0x3] %vm1006_vm0, %v1258_v20  ;;  %v554_v22 = vmul.f32 %v1258_v20, %v1258_v20  ;;  %v527_v36 = vmul.f32 %v520_v28, %v1258_v20 }
 0x130   : > { %v534_v41 = vsub.f32 1.5, %v533_v38 }
 0x131   : > { %v555_v44 = vmul.f32 %v554_v22, %v1016_v4  ;;  %v529_v53 = vsub.f32 %v527_v36, %v528_v6 }
 0x132   : > { %v535_v46 = vmul.f32 %v861_v52, %v534_v41 }
 0x133   : > { %v556_v42 = vadd.f32 %v555_v44, %v553_v40 }
 0x134   : > { %v536_v35 = vmul.f32 %v535_v46, %v526_v61 }
 0x135   : > { %862 = vtanh.f32 %v556_v42 }
 0x136   : > { %v538_v48 = vsel %vm537_vm9, %v526_v61, %v536_v35 }
 0x137   : > { %v541_v49 = vsel %vm539_vm10, %v540_v47, %v538_v48 }
 0x138   : > { %v547_v43 = vmul.f32 %v545_v57, %v541_v49 }
 0x13a   : > { %v1272_v56 = vadd.f32 %v547_v43, %v529_v53 }
 0x13b   : > { %v863_v54 = vpop.eup %862 }
 0x13c   : > { %v591_v39 = vmul.f32 %v863_v54, %v1014_v3  ;;  %v562_v58 = vmul.f32 %v863_v54, %v1023_v8  ;;  %550 = vst.msk [vmem:[#allocation5 + $0x13] ss:$8 sm:$0x3] %vm1006_vm0, %v1272_v56  ;;  %v593_v50 = vmul.f32 %v1272_v56, %v1272_v56  ;;  %v558_v17 = vmul.f32 -0.0081, %v863_v54 }
 0x13d   : > { %v560_v61 = vmul.f32 0.0075, %v863_v54 }
 0x13e   : > { %v592_v59 = vadd.f32 %v591_v39, %v1018_v7  ;;  %v563_v60 = vadd.f32 %v562_v58, %v1025_v9  ;;  %v594_v57 = vmul.f32 %v593_v50, %v1016_v4  ;;  %v559_v24 = vadd.f32 1.0069, %v558_v17  ;;  %v662_v39 = vld [vmem:[#allocation1 + $0x6] ss:$9 sm:$0xff] }
 0x13f   : > { %v561_v14 = vsub.f32 0.0075, %v560_v61  ;;  %698 = vst [vmem:[#allocation1] sm:$0xff] %v1132_v2 }
 0x140   : > { %v564_v62 = vmul.f32 %v863_v54, %v563_v60  ;;  %v595_v63 = vadd.f32 %v594_v57, %v592_v59  ;;  %v566_v26 = vmul.f32 %v559_v24, %v1272_v56  ;;  %699 = vst [vmem:[#allocation1 + $0x9] sm:$0xff] %v1137_v37 }
 0x141   : > { %v567_v52 = vmul.f32 %v561_v14, %v1258_v20 }
 0x142   : > { %v565_v12 = vadd.f32 %v564_v62, %v1023_v8  ;;  %864 = vtanh.f32 %v595_v63 }
 0x143   : > { %v568_v33 = vsub.f32 %v566_v26, %v567_v52 }
 0x144   : > { %866 = vrsqrt.f32 %v565_v12  ;;  %vm576_vm11 = vcmp.eq.f32.partialorder %v565_v12, inf  ;;  %v579_v29 = vand.u32 2147483648, %v565_v12  ;;  %vm578_vm12 = vcmp.eq.f32.partialorder %v565_v12, 0.0 }
 0x148   : > { %v865_v0 = vpop.eup %864 }
 0x149   : > { %v601_v11 = vmul.f32 %v865_v0, %v1023_v8  ;;  %v630_v38 = vmul.f32 %v865_v0, %v1014_v3  ;;  %v597_v44 = vmul.f32 -0.0081, %v865_v0  ;;  %v599_v20 = vmul.f32 0.0075, %v865_v0 }
 0x14a   : > { %v867_v10 = vpop.eup %866 }
 0x14b   : > { %v570_v15 = vmul.f32 %v867_v10, %v565_v12  ;;  %v602_v16 = vadd.f32 %v601_v11, %v1025_v9  ;;  %v631_v28 = vadd.f32 %v630_v38, %v1018_v7  ;;  %v598_v35 = vadd.f32 1.0069, %v597_v44 }
 0x14c   : > { %v600_v47 = vsub.f32 0.0075, %v599_v20 }
 0x14d   : > { %v571_v18 = vmul.f32 %v867_v10, %v570_v15  ;;  %v603_v19 = vmul.f32 %v865_v0, %v602_v16 }
 0x14e   : > { %v606_v53 = vmul.f32 %v600_v47, %v1272_v56 }
 0x14f   : > { %v572_v5 = vmul.f32 0.5, %v571_v18  ;;  %v604_v23 = vadd.f32 %v603_v19, %v1023_v8 }
 0x151   : > { %v573_v25 = vsub.f32 1.5, %v572_v5  ;;  %868 = vrsqrt.f32 %v604_v23  ;;  %vm615_vm13 = vcmp.eq.f32.partialorder %v604_v23, inf  ;;  %vm617_vm14 = vcmp.eq.f32.partialorder %v604_v23, 0.0 }
 0x153   : > { %v574_v30 = vmul.f32 %v867_v10, %v573_v25 }
 0x155   : > { %v575_v27 = vmul.f32 %v574_v30, %v565_v12 }
 0x157   : > { %v577_v31 = vsel %vm576_vm11, %v565_v12, %v575_v27  ;;  %v869_v21 = vpop.eup %868 }
 0x158   : > { %v580_v32 = vsel %vm578_vm12, %v579_v29, %v577_v31  ;;  %v609_v22 = vmul.f32 %v869_v21, %v604_v23 }
 0x159   : > { %v586_v55 = vmul.f32 %v584_v51, %v580_v32  ;;  %v618_v51 = vand.u32 2147483648, %v604_v23 }
 0x15a   : > { %v610_v40 = vmul.f32 %v869_v21, %v609_v22 }
 0x15b   : > { %v587_v34 = vadd.f32 %v586_v55, %v568_v33 }
 0x15c   : > { %v611_v42 = vmul.f32 0.5, %v610_v40 }
 0x15d   : > { %589 = vst.msk [vmem:[#allocation5 + $0x14] ss:$8 sm:$0x3] %vm1006_vm0, %v587_v34  ;;  %v632_v41 = vmul.f32 %v587_v34, %v587_v34  ;;  %v605_v48 = vmul.f32 %v598_v35, %v587_v34 }
 0x15e   : > { %v612_v46 = vsub.f32 1.5, %v611_v42 }
 0x15f   : > { %v633_v45 = vmul.f32 %v632_v41, %v1016_v4  ;;  %v607_v58 = vsub.f32 %v605_v48, %v606_v53 }
 0x160   : > { %v613_v6 = vmul.f32 %v869_v21, %v612_v46 }
 0x161   : > { %v634_v36 = vadd.f32 %v633_v45, %v631_v28 }
 0x162   : > { %v614_v49 = vmul.f32 %v613_v6, %v604_v23 }
 0x163   : > { %870 = vtanh.f32 %v634_v36 }
 0x164   : > { %v616_v43 = vsel %vm615_vm13, %v604_v23, %v614_v49 }
 0x165   : > { %v619_v54 = vsel %vm617_vm14, %v618_v51, %v616_v43  ;;  %v701_v43 = vld [vmem:[#allocation1 + $0x7] ss:$9 sm:$0xff] }
 0x166   : > { %v625_v50 = vmul.f32 %v623_v13, %v619_v54 }
 0x168   : > { %v626_v60 = vadd.f32 %v625_v50, %v607_v58 }
 0x169   : > { %v871_v59 = vpop.eup %870 }
 0x16a   : > { %v669_v57 = vmul.f32 %v871_v59, %v1014_v3  ;;  %v640_v62 = vmul.f32 %v871_v59, %v1023_v8  ;;  %628 = vst.msk [vmem:[#allocation5 + $0x15] ss:$8 sm:$0x3] %vm1006_vm0, %v626_v60  ;;  %v671_v56 = vmul.f32 %v626_v60, %v626_v60  ;;  %v636_v61 = vmul.f32 -0.0081, %v871_v59 }
 0x16b   : > { %v638_v18 = vmul.f32 0.0075, %v871_v59 }
 0x16c   : > { %v670_v63 = vadd.f32 %v669_v57, %v1018_v7  ;;  %v641_v12 = vadd.f32 %v640_v62, %v1025_v9  ;;  %v672_v13 = vmul.f32 %v671_v56, %v1016_v4  ;;  %v637_v14 = vadd.f32 1.0069, %v636_v61 }
 0x16d   : > { %v639_v25 = vsub.f32 0.0075, %v638_v18 }
 0x16e   : > { %v642_v0 = vmul.f32 %v871_v59, %v641_v12  ;;  %v673_v2 = vadd.f32 %v672_v13, %v670_v63  ;;  %v644_v52 = vmul.f32 %v637_v14, %v626_v60 }
 0x16f   : > { %v645_v27 = vmul.f32 %v639_v25, %v587_v34 }
 0x170   : > { %v643_v37 = vadd.f32 %v642_v0, %v1023_v8  ;;  %872 = vtanh.f32 %v673_v2 }
 0x171   : > { %v646_v55 = vsub.f32 %v644_v52, %v645_v27 }
 0x172   : > { %874 = vrsqrt.f32 %v643_v37  ;;  %vm654_vm15 = vcmp.eq.f32.partialorder %v643_v37, inf  ;;  %v657_v31 = vand.u32 2147483648, %v643_v37  ;;  %vm656_vm2 = vcmp.eq.f32.partialorder %v643_v37, 0.0 }
 0x176   : > { %v873_v10 = vpop.eup %872 }
 0x177   : > { %v679_v15 = vmul.f32 %v873_v10, %v1023_v8  ;;  %v708_v44 = vmul.f32 %v873_v10, %v1014_v3  ;;  %v675_v20 = vmul.f32 -0.0081, %v873_v10  ;;  %v677_v34 = vmul.f32 0.0075, %v873_v10 }
 0x178   : > { %v875_v11 = vpop.eup %874 }
 0x179   : > { %v648_v16 = vmul.f32 %v875_v11, %v643_v37  ;;  %v680_v17 = vadd.f32 %v679_v15, %v1025_v9  ;;  %v709_v45 = vadd.f32 %v708_v44, %v1018_v7  ;;  %v676_v47 = vadd.f32 1.0069, %v675_v20 }
 0x17a   : > { %v678_v6 = vsub.f32 0.0075, %v677_v34 }
 0x17b   : > { %v649_v19 = vmul.f32 %v875_v11, %v648_v16  ;;  %v681_v5 = vmul.f32 %v873_v10, %v680_v17 }
 0x17c   : > { %v684_v54 = vmul.f32 %v678_v6, %v626_v60 }
 0x17d   : > { %v650_v23 = vmul.f32 0.5, %v649_v19  ;;  %v682_v24 = vadd.f32 %v681_v5, %v1023_v8 }
 0x17f   : > { %v651_v30 = vsub.f32 1.5, %v650_v23  ;;  %876 = vrsqrt.f32 %v682_v24  ;;  %vm693_vm3 = vcmp.eq.f32.partialorder %v682_v24, inf  ;;  %v696_v53 = vand.u32 2147483648, %v682_v24 }
 0x180   : > { %vm695_vm4 = vcmp.eq.f32.partialorder %v682_v24, 0.0 }
 0x181   : > { %v652_v26 = vmul.f32 %v875_v11, %v651_v30 }
 0x183   : > { %v653_v29 = vmul.f32 %v652_v26, %v643_v37 }
 0x185   : > { %v655_v21 = vsel %vm654_vm15, %v643_v37, %v653_v29  ;;  %v877_v32 = vpop.eup %876 }
 0x186   : > { %v658_v33 = vsel %vm656_vm2, %v657_v31, %v655_v21  ;;  %v687_v38 = vmul.f32 %v877_v32, %v682_v24 }
 0x187   : > { %v664_v22 = vmul.f32 %v662_v39, %v658_v33 }
 0x188   : > { %v688_v41 = vmul.f32 %v877_v32, %v687_v38 }
 0x189   : > { %v665_v40 = vadd.f32 %v664_v22, %v646_v55  }
 0x18a   : > { %v689_v28 = vmul.f32 0.5, %v688_v41 }
 0x18b   : > { %667 = vst.msk [vmem:[#allocation5 + $0x16] ss:$8 sm:$0x3] %vm1006_vm0, %v665_v40  ;;  %v710_v42 = vmul.f32 %v665_v40, %v665_v40  ;;  %v683_v49 = vmul.f32 %v676_v47, %v665_v40  ;;  %v1346_v6 = vmov %v665_v40 }
 0x18c   : > { %v690_v36 = vsub.f32 1.5, %v689_v28  ;;  %729 = vst.msk [vmem:[#allocation4] sm:$0x3] (%p68_p0), %vm1006_vm0, %v665_v40 }
 0x18d   : > { %v711_v46 = vmul.f32 %v710_v42, %v1016_v4  ;;  %v685_v50 = vsub.f32 %v683_v49, %v684_v54 }
 0x18e   : > { %v691_v48 = vmul.f32 %v877_v32, %v690_v36 }
 0x18f   : > { %v712_v35 = vadd.f32 %v711_v46, %v709_v45  }
 0x190   : > { %v692_v51 = vmul.f32 %v691_v48, %v682_v24 }
 0x191   : > { %v1348_v10 = vmov %v712_v35  ;;  %727 = vst.msk [vmem:[#allocation2] sm:$0x3] (%p68_p0), %vm1006_vm0, %v712_v35 }
 0x192   : > { %v694_v39 = vsel %vm693_vm3, %v682_v24, %v692_v51 }
 0x193   : > { %v697_v58 = vsel %vm695_vm4, %v696_v53, %v694_v39 }
 0x194   : > { %v703_v59 = vmul.f32 %v701_v43, %v697_v58 }
 0x196   : > { %v704_v57 = vadd.f32 %v703_v59, %v685_v50  }
 0x198   : > { %706 = vst.msk [vmem:[#allocation5 + $0x17] ss:$8 sm:$0x3] %vm1006_vm0, %v704_v57  ;;  %v1347_v5 = vmov %v704_v57 }
 0x199   :  { %728 = vst.msk [vmem:[#allocation3] sm:$0x3] (%p68_p0), %vm1006_vm0, %v704_v57 }
 0x19d   :  { %70 = sbr.rel (!%p68_p0) target bundleno = 33 (0x21), region = 70 }
 0x19f   : > { %v715_v62 = vld [vmem:[#allocation5 + $0x10] sm:$0xff]  ;;  %v716_v56 = vld [vmem:[#allocation5 + $0x18] sm:$0xff] }
 0x1a0   : > { %721 = vst [vmem:[%s1219_s8 + $0x10] sm:$0xff] %v715_v62 }
 0x1a1   : > { %722 = vst [vmem:[%s1219_s8 + $0x18] sm:$0xff] %v716_v56 }
 0x1a2   :  { %733 = vsyncadd [#allocation10], 256  ;;  %s736_s11 = sshll.u32 %s1343_s2, 4  ;;  %s981_s12 = smov [#allocation11]   ;;  %s737_s11 = int_to_ptr.hbm [resolvable:$true] %s736_s11 }
 0x1a3   :  { %s734_s13 = sshll.u32 %s981_s12, 4  ;;  %s735_s13 = int_to_ptr.vmem [resolvable:$true] %s734_s13 }
 0x1a4   :  { %742 = dma.vmem_to_hbm [thread:$0]  %s735_s13, 1792, %s737_s11, [#allocation10], %s978_s18, %s978_s18, %s979_s19  }
 0x1a5   :  { %958 = dma.done.wait [#allocation10], 2048  }
 0x1a6   :  { %959 = vsyncadd [#allocation10], 4294965248 }
 0x1a7   :  { %747 = vsyncpa [#allocation9], 1 }
 0x1a8   :  { %748 = vsyncpa [#allocation10], 1 }

</bundles_post_ra>
